<compile_context>
chip_gen: v7x
topology: tpu7x:2x2x1
jax: 0.10.0
libtpu: 0.0.40
codegen_flags: <defaults>
</compile_context>

<pallas_src>
import functools
import math

import jax
import jax.numpy as jnp
from jax import lax
from jax.experimental import pallas as pl
from jax.experimental.pallas import tpu as pltpu


CLS_PAD = 128  # lane-dense classifier output width (sliced to O outside)


# ----------------------------------------------------------------------------
# Fused kernel: embedding + all SelfattLayers + classifier (no grid).
# ----------------------------------------------------------------------------
def fused_forward_kernel(in_ids_ref, tag_ids_ref, emb_ref,
                         wqkv_ref, bqkv_ref, wd_ref, bd_ref,
                         gamma_ref, beta_ref, wcls_ref, bcls_ref, o_ref,
                         *, num_layers, num_heads, head_dim, batch, seq,
                         vocab_size):
    hidden = num_heads * head_dim
    rows = batch * seq

    # --- Embedding lookup as a one-hot matmul (fused, exact gather+average) --
    vocab_iota = lax.broadcasted_iota(jnp.int32, (rows, vocab_size), 1)
    onehot = ((vocab_iota == in_ids_ref[...]).astype(jnp.float32)
              + (vocab_iota == tag_ids_ref[...]).astype(jnp.float32)) * 0.5
    x = jnp.dot(onehot, emb_ref[...],
                preferred_element_type=jnp.float32)          # [B*S, H], f32

    for layer in range(num_layers):                          # static unroll
        # Packed QKV projection (1/sqrt(head_dim) folded into Wq/bq columns).
        qkv = (jnp.dot(x.astype(jnp.bfloat16), wqkv_ref[layer],
                       preferred_element_type=jnp.float32)
               + bqkv_ref[layer])                            # [B*S, 3H] f32

        # Per-head scaled dot-product attention, batched over B via einsum.
        ctx_parts = []
        for h in range(num_heads):                           # static unroll
            lo = h * head_dim
            hi = lo + head_dim
            qh = qkv[:, lo:hi].reshape(batch, seq, head_dim).astype(jnp.bfloat16)
            kh = qkv[:, hidden + lo:hidden + hi].reshape(
                batch, seq, head_dim).astype(jnp.bfloat16)
            vh = qkv[:, 2 * hidden + lo:2 * hidden + hi].reshape(
                batch, seq, head_dim).astype(jnp.bfloat16)
            s = jnp.einsum("bqd,bkd->bqk", qh, kh,
                           preferred_element_type=jnp.float32)
            s = s - jnp.max(s, axis=-1, keepdims=True)
            p = jnp.exp(s)
            p = p / jnp.sum(p, axis=-1, keepdims=True)       # exact softmax
            ctx_h = jnp.einsum("bqk,bkd->bqd", p.astype(jnp.bfloat16), vh,
                               preferred_element_type=jnp.float32)
            ctx_parts.append(ctx_h.reshape(rows, head_dim))
        ctx = jnp.concatenate(ctx_parts, axis=-1)            # [B*S, H] f32

        # FeedForwardLayer: dense -> (dropout = identity) -> LayerNorm(resid)
        dense = (jnp.dot(ctx.astype(jnp.bfloat16), wd_ref[layer],
                         preferred_element_type=jnp.float32)
                 + bd_ref[layer])
        resid = dense + x
        # One-pass LayerNorm statistics: var = E[x^2] - E[x]^2.
        mean = jnp.mean(resid, axis=-1, keepdims=True)
        msq = jnp.mean(resid * resid, axis=-1, keepdims=True)
        var = msq - mean * mean
        x = ((resid - mean) * lax.rsqrt(var + 1e-12)
             * gamma_ref[layer] + beta_ref[layer])

    # Classifier, padded to CLS_PAD lanes so the single store is lane-dense.
    logits = (jnp.dot(x.astype(jnp.bfloat16), wcls_ref[...],
                      preferred_element_type=jnp.float32)
              + bcls_ref[...])
    o_ref[...] = logits.astype(o_ref.dtype)


# ----------------------------------------------------------------------------
# Wrapper (jitted so the tiny id reshapes + final slice fuse around the kernel)
# ----------------------------------------------------------------------------
@functools.partial(jax.jit,
                   static_argnames=("num_heads", "num_layers", "output_size"))
def ingredient_parser_forward(packed, input_ids, tag_ids, *,
                              num_heads, num_layers, output_size):
    B, S = input_ids.shape
    V, H = packed["emb"].shape
    head_dim = H // num_heads

    kernel = functools.partial(
        fused_forward_kernel, num_layers=num_layers, num_heads=num_heads,
        head_dim=head_dim, batch=B, seq=S, vocab_size=V)

    vmem = pl.BlockSpec(memory_space=pltpu.MemorySpace.VMEM)
    out = pl.pallas_call(
        kernel,
        out_shape=jax.ShapeDtypeStruct((B * S, CLS_PAD), jnp.float32),
        in_specs=[vmem] * 11,
        out_specs=vmem,
    )(input_ids.reshape(B * S, 1).astype(jnp.int32),
      tag_ids.reshape(B * S, 1).astype(jnp.int32),
      packed["emb"], packed["wqkv"], packed["bqkv"], packed["wd"],
      packed["bd"], packed["gamma"], packed["beta"],
      packed["wcls"], packed["bcls"])

    return out[:, :output_size].reshape(B, S, output_size)


# ----------------------------------------------------------------------------
# Deterministic parameter init (PyTorch-style) + packing for the fused kernel
# ----------------------------------------------------------------------------
def init_params(key, vocab_size, hidden_size, output_size, num_layers):
    keys = jax.random.split(key, 3 + num_layers)

    def linear(k, fan_in, fan_out):
        kw, kb = jax.random.split(k)
        bound = 1.0 / math.sqrt(fan_in)
        # Stored as [in, out] (transposed vs. PyTorch's [out, in]).
        w = jax.random.uniform(kw, (fan_in, fan_out), jnp.float32, -bound, bound)
        b = jax.random.uniform(kb, (1, fan_out), jnp.float32, -bound, bound)
        return w, b

    params = {
        "word_embedding": jax.random.normal(
            keys[0], (vocab_size, hidden_size), jnp.float32) * 0.1,
    }
    params["cls_w"], params["cls_b"] = linear(keys[1], hidden_size, output_size)

    layers = []
    for i in range(num_layers):
        lk = jax.random.split(keys[3 + i], 4)
        wq, bq = linear(lk[0], hidden_size, hidden_size)
        wk, bk = linear(lk[1], hidden_size, hidden_size)
        wv, bv = linear(lk[2], hidden_size, hidden_size)
        wd, bd = linear(lk[3], hidden_size, hidden_size)
        layers.append({
            "wq": wq, "bq": bq, "wk": wk, "bk": bk, "wv": wv, "bv": bv,
            "wd": wd, "bd": bd,
            "gamma": jnp.ones((1, hidden_size), jnp.float32),
            "beta": jnp.zeros((1, hidden_size), jnp.float32),
        })
    params["layers"] = layers
    return params


def pack_params(params, num_heads, cls_pad=CLS_PAD):
    """Pack per-layer weights into stacked, kernel-friendly tensors.

    Matmul weights are stored in bf16 (MXU inputs); biases / LayerNorm params
    and the embedding table stay f32.
    """
    H = params["layers"][0]["wq"].shape[0]
    head_dim = H // num_heads
    inv_sqrt_d = 1.0 / math.sqrt(head_dim)

    wqkv, bqkv, wd, bd, gamma, beta = [], [], [], [], [], []
    for lp in params["layers"]:
        # Fold the 1/sqrt(head_dim) attention scale into Wq / bq.
        wqkv.append(jnp.concatenate(
            [lp["wq"] * inv_sqrt_d, lp["wk"], lp["wv"]], axis=1))   # [H, 3H]
        bqkv.append(jnp.concatenate(
            [lp["bq"] * inv_sqrt_d, lp["bk"], lp["bv"]], axis=1))   # [1, 3H]
        wd.append(lp["wd"])
        bd.append(lp["bd"])
        gamma.append(lp["gamma"])
        beta.append(lp["beta"])

    O = params["cls_w"].shape[1]
    wcls = jnp.zeros((H, cls_pad), jnp.float32).at[:, :O].set(params["cls_w"])
    bcls = jnp.zeros((1, cls_pad), jnp.float32).at[:, :O].set(params["cls_b"])

    return {
        "emb": params["word_embedding"].astype(jnp.float32),   # [V, H]
        "wqkv": jnp.stack(wqkv).astype(jnp.bfloat16),           # [L, H, 3H]
        "bqkv": jnp.stack(bqkv),                                # [L, 1, 3H] f32
        "wd": jnp.stack(wd).astype(jnp.bfloat16),               # [L, H, H]
        "bd": jnp.stack(bd),                                    # [L, 1, H] f32
        "gamma": jnp.stack(gamma),                              # [L, 1, H] f32
        "beta": jnp.stack(beta),                                # [L, 1, H] f32
        "wcls": wcls.astype(jnp.bfloat16),                      # [H, 128]
        "bcls": bcls,                                           # [1, 128] f32
    }


# ----------------------------------------------------------------------------
if __name__ == "__main__":
    BATCH = 2
    SEQ = 8
    HIDDEN = 32
    HEADS = 4
    LAYERS = 2
    OUTPUT = 8
    VOCAB = 50

    key = jax.random.PRNGKey(0)
    pkey, ikey, tkey = jax.random.split(key, 3)

    params = init_params(pkey, VOCAB, HIDDEN, OUTPUT, LAYERS)
    packed = pack_params(params, HEADS)

    input_ids = jax.random.randint(ikey, (BATCH, SEQ), 0, VOCAB, dtype=jnp.int32)
    tag_ids = jax.random.randint(tkey, (BATCH, SEQ), 0, VOCAB, dtype=jnp.int32)

    logits = ingredient_parser_forward(
        packed, input_ids, tag_ids,
        num_heads=HEADS, num_layers=LAYERS, output_size=OUTPUT)
    logits = jax.block_until_ready(logits)

    assert logits.shape == (BATCH, SEQ, OUTPUT)
    assert bool(jnp.all(jnp.isfinite(logits)))
    print("KERNEL_OK")
</pallas_src>

<mosaic_0001>
module attributes {stable_mosaic.version = 11 : i64} {
  func.func @fused_forward_kernel(%arg0: memref<16x1xi32, #tpu.memory_space<vmem>>, %arg1: memref<16x1xi32, #tpu.memory_space<vmem>>, %arg2: memref<50x32xf32, #tpu.memory_space<vmem>>, %arg3: memref<2x32x96xbf16, #tpu.memory_space<vmem>>, %arg4: memref<2x1x96xf32, #tpu.memory_space<vmem>>, %arg5: memref<2x32x32xbf16, #tpu.memory_space<vmem>>, %arg6: memref<2x1x32xf32, #tpu.memory_space<vmem>>, %arg7: memref<2x1x32xf32, #tpu.memory_space<vmem>>, %arg8: memref<2x1x32xf32, #tpu.memory_space<vmem>>, %arg9: memref<32x128xbf16, #tpu.memory_space<vmem>>, %arg10: memref<1x128xf32, #tpu.memory_space<vmem>>, %arg11: memref<16x128xf32, #tpu.memory_space<vmem>>) attributes {dimension_semantics = [], scalar_prefetch = 0 : i64, scratch_operands = 0 : i64, tpu.core_type = #tpu.core_type<tc>} {
    %0 = tpu.iota {dimensions = array<i32: 1>} : vector<16x50xi32>
    %c0 = arith.constant 0 : index
    %c0_0 = arith.constant 0 : index
    %1 = vector.load %arg0[%c0, %c0_0] : memref<16x1xi32, #tpu.memory_space<vmem>>, vector<16x1xi32>
    %2 = vector.broadcast %1 : vector<16x1xi32> to vector<16x50xi32>
    %3 = arith.cmpi eq, %0, %2 : vector<16x50xi32>
    %4 = arith.extui %3 : vector<16x50xi1> to vector<16x50xi32>
    %5 = arith.sitofp %4 : vector<16x50xi32> to vector<16x50xf32>
    %c0_1 = arith.constant 0 : index
    %c0_2 = arith.constant 0 : index
    %6 = vector.load %arg1[%c0_1, %c0_2] : memref<16x1xi32, #tpu.memory_space<vmem>>, vector<16x1xi32>
    %7 = vector.broadcast %6 : vector<16x1xi32> to vector<16x50xi32>
    %8 = arith.cmpi eq, %0, %7 : vector<16x50xi32>
    %9 = arith.extui %8 : vector<16x50xi1> to vector<16x50xi32>
    %10 = arith.sitofp %9 : vector<16x50xi32> to vector<16x50xf32>
    %11 = arith.addf %5, %10 : vector<16x50xf32>
    %cst = arith.constant 5.000000e-01 : f32
    %12 = vector.broadcast %cst : f32 to vector<16x50xf32>
    %13 = arith.mulf %11, %12 : vector<16x50xf32>
    %c0_3 = arith.constant 0 : index
    %c0_4 = arith.constant 0 : index
    %14 = vector.load %arg2[%c0_3, %c0_4] : memref<50x32xf32, #tpu.memory_space<vmem>>, vector<50x32xf32>
    %cst_5 = arith.constant dense<0.000000e+00> : vector<16x32xf32>
    %15 = tpu.matmul %13, %14, %cst_5 {dimension_numbers = #tpu.dot_dimension_numbers<[1], [0], [0], [1], [0, 0, 1, 1], [], []>} : vector<16x50xf32>, vector<50x32xf32>, vector<16x32xf32> -> vector<16x32xf32>
    %16 = arith.truncf %15 : vector<16x32xf32> to vector<16x32xbf16>
    %c0_6 = arith.constant 0 : index
    %c0_7 = arith.constant 0 : index
    %c0_8 = arith.constant 0 : index
    %17 = vector.load %arg3[%c0_6, %c0_7, %c0_8] : memref<2x32x96xbf16, #tpu.memory_space<vmem>>, vector<1x32x96xbf16>
    %18 = vector.shape_cast %17 : vector<1x32x96xbf16> to vector<32x96xbf16>
    %cst_9 = arith.constant dense<0.000000e+00> : vector<16x96xf32>
    %19 = tpu.matmul %16, %18, %cst_9 {dimension_numbers = #tpu.dot_dimension_numbers<[1], [0], [0], [1], [0, 0, 1, 1], [], []>} : vector<16x32xbf16>, vector<32x96xbf16>, vector<16x96xf32> -> vector<16x96xf32>
    %c0_10 = arith.constant 0 : index
    %c0_11 = arith.constant 0 : index
    %c0_12 = arith.constant 0 : index
    %20 = vector.load %arg4[%c0_10, %c0_11, %c0_12] : memref<2x1x96xf32, #tpu.memory_space<vmem>>, vector<1x1x96xf32>
    %21 = vector.shape_cast %20 : vector<1x1x96xf32> to vector<1x96xf32>
    %22 = vector.broadcast %21 : vector<1x96xf32> to vector<16x96xf32>
    %23 = arith.addf %19, %22 : vector<16x96xf32>
    %24 = vector.extract_strided_slice %23 {offsets = [0, 0], sizes = [16, 8], strides = [1, 1]} : vector<16x96xf32> to vector<16x8xf32>
    %25 = vector.shape_cast %24 : vector<16x8xf32> to vector<2x8x8xf32>
    %26 = arith.truncf %25 : vector<2x8x8xf32> to vector<2x8x8xbf16>
    %27 = vector.extract_strided_slice %23 {offsets = [0, 32], sizes = [16, 8], strides = [1, 1]} : vector<16x96xf32> to vector<16x8xf32>
    %28 = vector.shape_cast %27 : vector<16x8xf32> to vector<2x8x8xf32>
    %29 = arith.truncf %28 : vector<2x8x8xf32> to vector<2x8x8xbf16>
    %30 = vector.extract_strided_slice %23 {offsets = [0, 64], sizes = [16, 8], strides = [1, 1]} : vector<16x96xf32> to vector<16x8xf32>
    %31 = vector.shape_cast %30 : vector<16x8xf32> to vector<2x8x8xf32>
    %32 = arith.truncf %31 : vector<2x8x8xf32> to vector<2x8x8xbf16>
    "tpu.trace_start"() <{level = 10 : i32, message = "bqd,bkd->bqk"}> : () -> ()
    %cst_13 = arith.constant dense<0.000000e+00> : vector<2x8x8xf32>
    %33 = tpu.matmul %26, %29, %cst_13 {dimension_numbers = #tpu.dot_dimension_numbers<[2], [2], [1], [1], [0, 0, 0, 1, 1, 1], [0], [0]>} : vector<2x8x8xbf16>, vector<2x8x8xbf16>, vector<2x8x8xf32> -> vector<2x8x8xf32>
    "tpu.trace_stop"() : () -> ()
    %cst_14 = arith.constant dense<0xFF800000> : vector<2x8xf32>
    %34 = vector.multi_reduction <maximumf>, %33, %cst_14 [2] : vector<2x8x8xf32> to vector<2x8xf32>
    %35 = vector.shape_cast %34 : vector<2x8xf32> to vector<2x8x1xf32>
    %36 = vector.broadcast %35 : vector<2x8x1xf32> to vector<2x8x8xf32>
    %37 = arith.subf %33, %36 : vector<2x8x8xf32>
    %38 = math.exp %37 : vector<2x8x8xf32>
    %cst_15 = arith.constant dense<0.000000e+00> : vector<2x8xf32>
    %39 = vector.multi_reduction <add>, %38, %cst_15 [2] : vector<2x8x8xf32> to vector<2x8xf32>
    %40 = vector.shape_cast %39 : vector<2x8xf32> to vector<2x8x1xf32>
    %41 = vector.broadcast %40 : vector<2x8x1xf32> to vector<2x8x8xf32>
    %42 = arith.divf %38, %41 : vector<2x8x8xf32>
    %43 = arith.truncf %42 : vector<2x8x8xf32> to vector<2x8x8xbf16>
    "tpu.trace_start"() <{level = 10 : i32, message = "bqk,bkd->bqd"}> : () -> ()
    %cst_16 = arith.constant dense<0.000000e+00> : vector<2x8x8xf32>
    %44 = tpu.matmul %43, %32, %cst_16 {dimension_numbers = #tpu.dot_dimension_numbers<[2], [1], [1], [2], [0, 0, 0, 1, 1, 2], [0], [0]>} : vector<2x8x8xbf16>, vector<2x8x8xbf16>, vector<2x8x8xf32> -> vector<2x8x8xf32>
    "tpu.trace_stop"() : () -> ()
    %45 = vector.shape_cast %44 : vector<2x8x8xf32> to vector<16x8xf32>
    %46 = vector.extract_strided_slice %23 {offsets = [0, 8], sizes = [16, 8], strides = [1, 1]} : vector<16x96xf32> to vector<16x8xf32>
    %47 = vector.shape_cast %46 : vector<16x8xf32> to vector<2x8x8xf32>
    %48 = arith.truncf %47 : vector<2x8x8xf32> to vector<2x8x8xbf16>
    %49 = vector.extract_strided_slice %23 {offsets = [0, 40], sizes = [16, 8], strides = [1, 1]} : vector<16x96xf32> to vector<16x8xf32>
    %50 = vector.shape_cast %49 : vector<16x8xf32> to vector<2x8x8xf32>
    %51 = arith.truncf %50 : vector<2x8x8xf32> to vector<2x8x8xbf16>
    %52 = vector.extract_strided_slice %23 {offsets = [0, 72], sizes = [16, 8], strides = [1, 1]} : vector<16x96xf32> to vector<16x8xf32>
    %53 = vector.shape_cast %52 : vector<16x8xf32> to vector<2x8x8xf32>
    %54 = arith.truncf %53 : vector<2x8x8xf32> to vector<2x8x8xbf16>
    "tpu.trace_start"() <{level = 10 : i32, message = "bqd,bkd->bqk"}> : () -> ()
    %cst_17 = arith.constant dense<0.000000e+00> : vector<2x8x8xf32>
    %55 = tpu.matmul %48, %51, %cst_17 {dimension_numbers = #tpu.dot_dimension_numbers<[2], [2], [1], [1], [0, 0, 0, 1, 1, 1], [0], [0]>} : vector<2x8x8xbf16>, vector<2x8x8xbf16>, vector<2x8x8xf32> -> vector<2x8x8xf32>
    "tpu.trace_stop"() : () -> ()
    %cst_18 = arith.constant dense<0xFF800000> : vector<2x8xf32>
    %56 = vector.multi_reduction <maximumf>, %55, %cst_18 [2] : vector<2x8x8xf32> to vector<2x8xf32>
    %57 = vector.shape_cast %56 : vector<2x8xf32> to vector<2x8x1xf32>
    %58 = vector.broadcast %57 : vector<2x8x1xf32> to vector<2x8x8xf32>
    %59 = arith.subf %55, %58 : vector<2x8x8xf32>
    %60 = math.exp %59 : vector<2x8x8xf32>
    %cst_19 = arith.constant dense<0.000000e+00> : vector<2x8xf32>
    %61 = vector.multi_reduction <add>, %60, %cst_19 [2] : vector<2x8x8xf32> to vector<2x8xf32>
    %62 = vector.shape_cast %61 : vector<2x8xf32> to vector<2x8x1xf32>
    %63 = vector.broadcast %62 : vector<2x8x1xf32> to vector<2x8x8xf32>
    %64 = arith.divf %60, %63 : vector<2x8x8xf32>
    %65 = arith.truncf %64 : vector<2x8x8xf32> to vector<2x8x8xbf16>
    "tpu.trace_start"() <{level = 10 : i32, message = "bqk,bkd->bqd"}> : () -> ()
    %cst_20 = arith.constant dense<0.000000e+00> : vector<2x8x8xf32>
    %66 = tpu.matmul %65, %54, %cst_20 {dimension_numbers = #tpu.dot_dimension_numbers<[2], [1], [1], [2], [0, 0, 0, 1, 1, 2], [0], [0]>} : vector<2x8x8xbf16>, vector<2x8x8xbf16>, vector<2x8x8xf32> -> vector<2x8x8xf32>
    "tpu.trace_stop"() : () -> ()
    %67 = vector.shape_cast %66 : vector<2x8x8xf32> to vector<16x8xf32>
    %68 = vector.extract_strided_slice %23 {offsets = [0, 16], sizes = [16, 8], strides = [1, 1]} : vector<16x96xf32> to vector<16x8xf32>
    %69 = vector.shape_cast %68 : vector<16x8xf32> to vector<2x8x8xf32>
    %70 = arith.truncf %69 : vector<2x8x8xf32> to vector<2x8x8xbf16>
    %71 = vector.extract_strided_slice %23 {offsets = [0, 48], sizes = [16, 8], strides = [1, 1]} : vector<16x96xf32> to vector<16x8xf32>
    %72 = vector.shape_cast %71 : vector<16x8xf32> to vector<2x8x8xf32>
    %73 = arith.truncf %72 : vector<2x8x8xf32> to vector<2x8x8xbf16>
    %74 = vector.extract_strided_slice %23 {offsets = [0, 80], sizes = [16, 8], strides = [1, 1]} : vector<16x96xf32> to vector<16x8xf32>
    %75 = vector.shape_cast %74 : vector<16x8xf32> to vector<2x8x8xf32>
    %76 = arith.truncf %75 : vector<2x8x8xf32> to vector<2x8x8xbf16>
    "tpu.trace_start"() <{level = 10 : i32, message = "bqd,bkd->bqk"}> : () -> ()
    %cst_21 = arith.constant dense<0.000000e+00> : vector<2x8x8xf32>
    %77 = tpu.matmul %70, %73, %cst_21 {dimension_numbers = #tpu.dot_dimension_numbers<[2], [2], [1], [1], [0, 0, 0, 1, 1, 1], [0], [0]>} : vector<2x8x8xbf16>, vector<2x8x8xbf16>, vector<2x8x8xf32> -> vector<2x8x8xf32>
    "tpu.trace_stop"() : () -> ()
    %cst_22 = arith.constant dense<0xFF800000> : vector<2x8xf32>
    %78 = vector.multi_reduction <maximumf>, %77, %cst_22 [2] : vector<2x8x8xf32> to vector<2x8xf32>
    %79 = vector.shape_cast %78 : vector<2x8xf32> to vector<2x8x1xf32>
    %80 = vector.broadcast %79 : vector<2x8x1xf32> to vector<2x8x8xf32>
    %81 = arith.subf %77, %80 : vector<2x8x8xf32>
    %82 = math.exp %81 : vector<2x8x8xf32>
    %cst_23 = arith.constant dense<0.000000e+00> : vector<2x8xf32>
    %83 = vector.multi_reduction <add>, %82, %cst_23 [2] : vector<2x8x8xf32> to vector<2x8xf32>
    %84 = vector.shape_cast %83 : vector<2x8xf32> to vector<2x8x1xf32>
    %85 = vector.broadcast %84 : vector<2x8x1xf32> to vector<2x8x8xf32>
    %86 = arith.divf %82, %85 : vector<2x8x8xf32>
    %87 = arith.truncf %86 : vector<2x8x8xf32> to vector<2x8x8xbf16>
    "tpu.trace_start"() <{level = 10 : i32, message = "bqk,bkd->bqd"}> : () -> ()
    %cst_24 = arith.constant dense<0.000000e+00> : vector<2x8x8xf32>
    %88 = tpu.matmul %87, %76, %cst_24 {dimension_numbers = #tpu.dot_dimension_numbers<[2], [1], [1], [2], [0, 0, 0, 1, 1, 2], [0], [0]>} : vector<2x8x8xbf16>, vector<2x8x8xbf16>, vector<2x8x8xf32> -> vector<2x8x8xf32>
    "tpu.trace_stop"() : () -> ()
    %89 = vector.shape_cast %88 : vector<2x8x8xf32> to vector<16x8xf32>
    %90 = vector.extract_strided_slice %23 {offsets = [0, 24], sizes = [16, 8], strides = [1, 1]} : vector<16x96xf32> to vector<16x8xf32>
    %91 = vector.shape_cast %90 : vector<16x8xf32> to vector<2x8x8xf32>
    %92 = arith.truncf %91 : vector<2x8x8xf32> to vector<2x8x8xbf16>
    %93 = vector.extract_strided_slice %23 {offsets = [0, 56], sizes = [16, 8], strides = [1, 1]} : vector<16x96xf32> to vector<16x8xf32>
    %94 = vector.shape_cast %93 : vector<16x8xf32> to vector<2x8x8xf32>
    %95 = arith.truncf %94 : vector<2x8x8xf32> to vector<2x8x8xbf16>
    %96 = vector.extract_strided_slice %23 {offsets = [0, 88], sizes = [16, 8], strides = [1, 1]} : vector<16x96xf32> to vector<16x8xf32>
    %97 = vector.shape_cast %96 : vector<16x8xf32> to vector<2x8x8xf32>
    %98 = arith.truncf %97 : vector<2x8x8xf32> to vector<2x8x8xbf16>
    "tpu.trace_start"() <{level = 10 : i32, message = "bqd,bkd->bqk"}> : () -> ()
    %cst_25 = arith.constant dense<0.000000e+00> : vector<2x8x8xf32>
    %99 = tpu.matmul %92, %95, %cst_25 {dimension_numbers = #tpu.dot_dimension_numbers<[2], [2], [1], [1], [0, 0, 0, 1, 1, 1], [0], [0]>} : vector<2x8x8xbf16>, vector<2x8x8xbf16>, vector<2x8x8xf32> -> vector<2x8x8xf32>
    "tpu.trace_stop"() : () -> ()
    %cst_26 = arith.constant dense<0xFF800000> : vector<2x8xf32>
    %100 = vector.multi_reduction <maximumf>, %99, %cst_26 [2] : vector<2x8x8xf32> to vector<2x8xf32>
    %101 = vector.shape_cast %100 : vector<2x8xf32> to vector<2x8x1xf32>
    %102 = vector.broadcast %101 : vector<2x8x1xf32> to vector<2x8x8xf32>
    %103 = arith.subf %99, %102 : vector<2x8x8xf32>
    %104 = math.exp %103 : vector<2x8x8xf32>
    %cst_27 = arith.constant dense<0.000000e+00> : vector<2x8xf32>
    %105 = vector.multi_reduction <add>, %104, %cst_27 [2] : vector<2x8x8xf32> to vector<2x8xf32>
    %106 = vector.shape_cast %105 : vector<2x8xf32> to vector<2x8x1xf32>
    %107 = vector.broadcast %106 : vector<2x8x1xf32> to vector<2x8x8xf32>
    %108 = arith.divf %104, %107 : vector<2x8x8xf32>
    %109 = arith.truncf %108 : vector<2x8x8xf32> to vector<2x8x8xbf16>
    "tpu.trace_start"() <{level = 10 : i32, message = "bqk,bkd->bqd"}> : () -> ()
    %cst_28 = arith.constant dense<0.000000e+00> : vector<2x8x8xf32>
    %110 = tpu.matmul %109, %98, %cst_28 {dimension_numbers = #tpu.dot_dimension_numbers<[2], [1], [1], [2], [0, 0, 0, 1, 1, 2], [0], [0]>} : vector<2x8x8xbf16>, vector<2x8x8xbf16>, vector<2x8x8xf32> -> vector<2x8x8xf32>
    "tpu.trace_stop"() : () -> ()
    %111 = vector.shape_cast %110 : vector<2x8x8xf32> to vector<16x8xf32>
    %112 = tpu.concatenate %45, %67, %89, %111 in 1 : vector<16x8xf32>, vector<16x8xf32>, vector<16x8xf32>, vector<16x8xf32> -> vector<16x32xf32>
    %113 = arith.truncf %112 : vector<16x32xf32> to vector<16x32xbf16>
    %c0_29 = arith.constant 0 : index
    %c0_30 = arith.constant 0 : index
    %c0_31 = arith.constant 0 : index
    %114 = vector.load %arg5[%c0_29, %c0_30, %c0_31] : memref<2x32x32xbf16, #tpu.memory_space<vmem>>, vector<1x32x32xbf16>
    %115 = vector.shape_cast %114 : vector<1x32x32xbf16> to vector<32x32xbf16>
    %cst_32 = arith.constant dense<0.000000e+00> : vector<16x32xf32>
    %116 = tpu.matmul %113, %115, %cst_32 {dimension_numbers = #tpu.dot_dimension_numbers<[1], [0], [0], [1], [0, 0, 1, 1], [], []>} : vector<16x32xbf16>, vector<32x32xbf16>, vector<16x32xf32> -> vector<16x32xf32>
    %c0_33 = arith.constant 0 : index
    %c0_34 = arith.constant 0 : index
    %c0_35 = arith.constant 0 : index
    %117 = vector.load %arg6[%c0_33, %c0_34, %c0_35] : memref<2x1x32xf32, #tpu.memory_space<vmem>>, vector<1x1x32xf32>
    %118 = vector.shape_cast %117 : vector<1x1x32xf32> to vector<1x32xf32>
    %119 = vector.broadcast %118 : vector<1x32xf32> to vector<16x32xf32>
    %120 = arith.addf %116, %119 : vector<16x32xf32>
    %121 = arith.addf %120, %15 : vector<16x32xf32>
    %cst_36 = arith.constant dense<0.000000e+00> : vector<16xf32>
    %122 = vector.multi_reduction <add>, %121, %cst_36 [1] : vector<16x32xf32> to vector<16xf32>
    %123 = vector.shape_cast %122 : vector<16xf32> to vector<16x1xf32>
    %cst_37 = arith.constant 3.200000e+01 : f32
    %124 = vector.broadcast %cst_37 : f32 to vector<16x1xf32>
    %125 = arith.divf %123, %124 : vector<16x1xf32>
    %126 = arith.mulf %121, %121 : vector<16x32xf32>
    %cst_38 = arith.constant dense<0.000000e+00> : vector<16xf32>
    %127 = vector.multi_reduction <add>, %126, %cst_38 [1] : vector<16x32xf32> to vector<16xf32>
    %128 = vector.shape_cast %127 : vector<16xf32> to vector<16x1xf32>
    %cst_39 = arith.constant 3.200000e+01 : f32
    %129 = vector.broadcast %cst_39 : f32 to vector<16x1xf32>
    %130 = arith.divf %128, %129 : vector<16x1xf32>
    %131 = arith.mulf %125, %125 : vector<16x1xf32>
    %132 = arith.subf %130, %131 : vector<16x1xf32>
    %133 = vector.broadcast %125 : vector<16x1xf32> to vector<16x32xf32>
    %134 = arith.subf %121, %133 : vector<16x32xf32>
    %cst_40 = arith.constant 9.99999996E-13 : f32
    %135 = vector.broadcast %cst_40 : f32 to vector<16x1xf32>
    %136 = arith.addf %132, %135 : vector<16x1xf32>
    %137 = math.rsqrt %136 : vector<16x1xf32>
    %138 = vector.broadcast %137 : vector<16x1xf32> to vector<16x32xf32>
    %139 = arith.mulf %134, %138 : vector<16x32xf32>
    %c0_41 = arith.constant 0 : index
    %c0_42 = arith.constant 0 : index
    %c0_43 = arith.constant 0 : index
    %140 = vector.load %arg7[%c0_41, %c0_42, %c0_43] : memref<2x1x32xf32, #tpu.memory_space<vmem>>, vector<1x1x32xf32>
    %141 = vector.shape_cast %140 : vector<1x1x32xf32> to vector<1x32xf32>
    %142 = vector.broadcast %141 : vector<1x32xf32> to vector<16x32xf32>
    %143 = arith.mulf %139, %142 : vector<16x32xf32>
    %c0_44 = arith.constant 0 : index
    %c0_45 = arith.constant 0 : index
    %c0_46 = arith.constant 0 : index
    %144 = vector.load %arg8[%c0_44, %c0_45, %c0_46] : memref<2x1x32xf32, #tpu.memory_space<vmem>>, vector<1x1x32xf32>
    %145 = vector.shape_cast %144 : vector<1x1x32xf32> to vector<1x32xf32>
    %146 = vector.broadcast %145 : vector<1x32xf32> to vector<16x32xf32>
    %147 = arith.addf %143, %146 : vector<16x32xf32>
    %148 = arith.truncf %147 : vector<16x32xf32> to vector<16x32xbf16>
    %c1 = arith.constant 1 : index
    %c0_47 = arith.constant 0 : index
    %c0_48 = arith.constant 0 : index
    %149 = vector.load %arg3[%c1, %c0_47, %c0_48] : memref<2x32x96xbf16, #tpu.memory_space<vmem>>, vector<1x32x96xbf16>
    %150 = vector.shape_cast %149 : vector<1x32x96xbf16> to vector<32x96xbf16>
    %cst_49 = arith.constant dense<0.000000e+00> : vector<16x96xf32>
    %151 = tpu.matmul %148, %150, %cst_49 {dimension_numbers = #tpu.dot_dimension_numbers<[1], [0], [0], [1], [0, 0, 1, 1], [], []>} : vector<16x32xbf16>, vector<32x96xbf16>, vector<16x96xf32> -> vector<16x96xf32>
    %c1_50 = arith.constant 1 : index
    %c0_51 = arith.constant 0 : index
    %c0_52 = arith.constant 0 : index
    %152 = vector.load %arg4[%c1_50, %c0_51, %c0_52] : memref<2x1x96xf32, #tpu.memory_space<vmem>>, vector<1x1x96xf32>
    %153 = vector.shape_cast %152 : vector<1x1x96xf32> to vector<1x96xf32>
    %154 = vector.broadcast %153 : vector<1x96xf32> to vector<16x96xf32>
    %155 = arith.addf %151, %154 : vector<16x96xf32>
    %156 = vector.extract_strided_slice %155 {offsets = [0, 0], sizes = [16, 8], strides = [1, 1]} : vector<16x96xf32> to vector<16x8xf32>
    %157 = vector.shape_cast %156 : vector<16x8xf32> to vector<2x8x8xf32>
    %158 = arith.truncf %157 : vector<2x8x8xf32> to vector<2x8x8xbf16>
    %159 = vector.extract_strided_slice %155 {offsets = [0, 32], sizes = [16, 8], strides = [1, 1]} : vector<16x96xf32> to vector<16x8xf32>
    %160 = vector.shape_cast %159 : vector<16x8xf32> to vector<2x8x8xf32>
    %161 = arith.truncf %160 : vector<2x8x8xf32> to vector<2x8x8xbf16>
    %162 = vector.extract_strided_slice %155 {offsets = [0, 64], sizes = [16, 8], strides = [1, 1]} : vector<16x96xf32> to vector<16x8xf32>
    %163 = vector.shape_cast %162 : vector<16x8xf32> to vector<2x8x8xf32>
    %164 = arith.truncf %163 : vector<2x8x8xf32> to vector<2x8x8xbf16>
    "tpu.trace_start"() <{level = 10 : i32, message = "bqd,bkd->bqk"}> : () -> ()
    %cst_53 = arith.constant dense<0.000000e+00> : vector<2x8x8xf32>
    %165 = tpu.matmul %158, %161, %cst_53 {dimension_numbers = #tpu.dot_dimension_numbers<[2], [2], [1], [1], [0, 0, 0, 1, 1, 1], [0], [0]>} : vector<2x8x8xbf16>, vector<2x8x8xbf16>, vector<2x8x8xf32> -> vector<2x8x8xf32>
    "tpu.trace_stop"() : () -> ()
    %cst_54 = arith.constant dense<0xFF800000> : vector<2x8xf32>
    %166 = vector.multi_reduction <maximumf>, %165, %cst_54 [2] : vector<2x8x8xf32> to vector<2x8xf32>
    %167 = vector.shape_cast %166 : vector<2x8xf32> to vector<2x8x1xf32>
    %168 = vector.broadcast %167 : vector<2x8x1xf32> to vector<2x8x8xf32>
    %169 = arith.subf %165, %168 : vector<2x8x8xf32>
    %170 = math.exp %169 : vector<2x8x8xf32>
    %cst_55 = arith.constant dense<0.000000e+00> : vector<2x8xf32>
    %171 = vector.multi_reduction <add>, %170, %cst_55 [2] : vector<2x8x8xf32> to vector<2x8xf32>
    %172 = vector.shape_cast %171 : vector<2x8xf32> to vector<2x8x1xf32>
    %173 = vector.broadcast %172 : vector<2x8x1xf32> to vector<2x8x8xf32>
    %174 = arith.divf %170, %173 : vector<2x8x8xf32>
    %175 = arith.truncf %174 : vector<2x8x8xf32> to vector<2x8x8xbf16>
    "tpu.trace_start"() <{level = 10 : i32, message = "bqk,bkd->bqd"}> : () -> ()
    %cst_56 = arith.constant dense<0.000000e+00> : vector<2x8x8xf32>
    %176 = tpu.matmul %175, %164, %cst_56 {dimension_numbers = #tpu.dot_dimension_numbers<[2], [1], [1], [2], [0, 0, 0, 1, 1, 2], [0], [0]>} : vector<2x8x8xbf16>, vector<2x8x8xbf16>, vector<2x8x8xf32> -> vector<2x8x8xf32>
    "tpu.trace_stop"() : () -> ()
    %177 = vector.shape_cast %176 : vector<2x8x8xf32> to vector<16x8xf32>
    %178 = vector.extract_strided_slice %155 {offsets = [0, 8], sizes = [16, 8], strides = [1, 1]} : vector<16x96xf32> to vector<16x8xf32>
    %179 = vector.shape_cast %178 : vector<16x8xf32> to vector<2x8x8xf32>
    %180 = arith.truncf %179 : vector<2x8x8xf32> to vector<2x8x8xbf16>
    %181 = vector.extract_strided_slice %155 {offsets = [0, 40], sizes = [16, 8], strides = [1, 1]} : vector<16x96xf32> to vector<16x8xf32>
    %182 = vector.shape_cast %181 : vector<16x8xf32> to vector<2x8x8xf32>
    %183 = arith.truncf %182 : vector<2x8x8xf32> to vector<2x8x8xbf16>
    %184 = vector.extract_strided_slice %155 {offsets = [0, 72], sizes = [16, 8], strides = [1, 1]} : vector<16x96xf32> to vector<16x8xf32>
    %185 = vector.shape_cast %184 : vector<16x8xf32> to vector<2x8x8xf32>
    %186 = arith.truncf %185 : vector<2x8x8xf32> to vector<2x8x8xbf16>
    "tpu.trace_start"() <{level = 10 : i32, message = "bqd,bkd->bqk"}> : () -> ()
    %cst_57 = arith.constant dense<0.000000e+00> : vector<2x8x8xf32>
    %187 = tpu.matmul %180, %183, %cst_57 {dimension_numbers = #tpu.dot_dimension_numbers<[2], [2], [1], [1], [0, 0, 0, 1, 1, 1], [0], [0]>} : vector<2x8x8xbf16>, vector<2x8x8xbf16>, vector<2x8x8xf32> -> vector<2x8x8xf32>
    "tpu.trace_stop"() : () -> ()
    %cst_58 = arith.constant dense<0xFF800000> : vector<2x8xf32>
    %188 = vector.multi_reduction <maximumf>, %187, %cst_58 [2] : vector<2x8x8xf32> to vector<2x8xf32>
    %189 = vector.shape_cast %188 : vector<2x8xf32> to vector<2x8x1xf32>
    %190 = vector.broadcast %189 : vector<2x8x1xf32> to vector<2x8x8xf32>
    %191 = arith.subf %187, %190 : vector<2x8x8xf32>
    %192 = math.exp %191 : vector<2x8x8xf32>
    %cst_59 = arith.constant dense<0.000000e+00> : vector<2x8xf32>
    %193 = vector.multi_reduction <add>, %192, %cst_59 [2] : vector<2x8x8xf32> to vector<2x8xf32>
    %194 = vector.shape_cast %193 : vector<2x8xf32> to vector<2x8x1xf32>
    %195 = vector.broadcast %194 : vector<2x8x1xf32> to vector<2x8x8xf32>
    %196 = arith.divf %192, %195 : vector<2x8x8xf32>
    %197 = arith.truncf %196 : vector<2x8x8xf32> to vector<2x8x8xbf16>
    "tpu.trace_start"() <{level = 10 : i32, message = "bqk,bkd->bqd"}> : () -> ()
    %cst_60 = arith.constant dense<0.000000e+00> : vector<2x8x8xf32>
    %198 = tpu.matmul %197, %186, %cst_60 {dimension_numbers = #tpu.dot_dimension_numbers<[2], [1], [1], [2], [0, 0, 0, 1, 1, 2], [0], [0]>} : vector<2x8x8xbf16>, vector<2x8x8xbf16>, vector<2x8x8xf32> -> vector<2x8x8xf32>
    "tpu.trace_stop"() : () -> ()
    %199 = vector.shape_cast %198 : vector<2x8x8xf32> to vector<16x8xf32>
    %200 = vector.extract_strided_slice %155 {offsets = [0, 16], sizes = [16, 8], strides = [1, 1]} : vector<16x96xf32> to vector<16x8xf32>
    %201 = vector.shape_cast %200 : vector<16x8xf32> to vector<2x8x8xf32>
    %202 = arith.truncf %201 : vector<2x8x8xf32> to vector<2x8x8xbf16>
    %203 = vector.extract_strided_slice %155 {offsets = [0, 48], sizes = [16, 8], strides = [1, 1]} : vector<16x96xf32> to vector<16x8xf32>
    %204 = vector.shape_cast %203 : vector<16x8xf32> to vector<2x8x8xf32>
    %205 = arith.truncf %204 : vector<2x8x8xf32> to vector<2x8x8xbf16>
    %206 = vector.extract_strided_slice %155 {offsets = [0, 80], sizes = [16, 8], strides = [1, 1]} : vector<16x96xf32> to vector<16x8xf32>
    %207 = vector.shape_cast %206 : vector<16x8xf32> to vector<2x8x8xf32>
    %208 = arith.truncf %207 : vector<2x8x8xf32> to vector<2x8x8xbf16>
    "tpu.trace_start"() <{level = 10 : i32, message = "bqd,bkd->bqk"}> : () -> ()
    %cst_61 = arith.constant dense<0.000000e+00> : vector<2x8x8xf32>
    %209 = tpu.matmul %202, %205, %cst_61 {dimension_numbers = #tpu.dot_dimension_numbers<[2], [2], [1], [1], [0, 0, 0, 1, 1, 1], [0], [0]>} : vector<2x8x8xbf16>, vector<2x8x8xbf16>, vector<2x8x8xf32> -> vector<2x8x8xf32>
    "tpu.trace_stop"() : () -> ()
    %cst_62 = arith.constant dense<0xFF800000> : vector<2x8xf32>
    %210 = vector.multi_reduction <maximumf>, %209, %cst_62 [2] : vector<2x8x8xf32> to vector<2x8xf32>
    %211 = vector.shape_cast %210 : vector<2x8xf32> to vector<2x8x1xf32>
    %212 = vector.broadcast %211 : vector<2x8x1xf32> to vector<2x8x8xf32>
    %213 = arith.subf %209, %212 : vector<2x8x8xf32>
    %214 = math.exp %213 : vector<2x8x8xf32>
    %cst_63 = arith.constant dense<0.000000e+00> : vector<2x8xf32>
    %215 = vector.multi_reduction <add>, %214, %cst_63 [2] : vector<2x8x8xf32> to vector<2x8xf32>
    %216 = vector.shape_cast %215 : vector<2x8xf32> to vector<2x8x1xf32>
    %217 = vector.broadcast %216 : vector<2x8x1xf32> to vector<2x8x8xf32>
    %218 = arith.divf %214, %217 : vector<2x8x8xf32>
    %219 = arith.truncf %218 : vector<2x8x8xf32> to vector<2x8x8xbf16>
    "tpu.trace_start"() <{level = 10 : i32, message = "bqk,bkd->bqd"}> : () -> ()
    %cst_64 = arith.constant dense<0.000000e+00> : vector<2x8x8xf32>
    %220 = tpu.matmul %219, %208, %cst_64 {dimension_numbers = #tpu.dot_dimension_numbers<[2], [1], [1], [2], [0, 0, 0, 1, 1, 2], [0], [0]>} : vector<2x8x8xbf16>, vector<2x8x8xbf16>, vector<2x8x8xf32> -> vector<2x8x8xf32>
    "tpu.trace_stop"() : () -> ()
    %221 = vector.shape_cast %220 : vector<2x8x8xf32> to vector<16x8xf32>
    %222 = vector.extract_strided_slice %155 {offsets = [0, 24], sizes = [16, 8], strides = [1, 1]} : vector<16x96xf32> to vector<16x8xf32>
    %223 = vector.shape_cast %222 : vector<16x8xf32> to vector<2x8x8xf32>
    %224 = arith.truncf %223 : vector<2x8x8xf32> to vector<2x8x8xbf16>
    %225 = vector.extract_strided_slice %155 {offsets = [0, 56], sizes = [16, 8], strides = [1, 1]} : vector<16x96xf32> to vector<16x8xf32>
    %226 = vector.shape_cast %225 : vector<16x8xf32> to vector<2x8x8xf32>
    %227 = arith.truncf %226 : vector<2x8x8xf32> to vector<2x8x8xbf16>
    %228 = vector.extract_strided_slice %155 {offsets = [0, 88], sizes = [16, 8], strides = [1, 1]} : vector<16x96xf32> to vector<16x8xf32>
    %229 = vector.shape_cast %228 : vector<16x8xf32> to vector<2x8x8xf32>
    %230 = arith.truncf %229 : vector<2x8x8xf32> to vector<2x8x8xbf16>
    "tpu.trace_start"() <{level = 10 : i32, message = "bqd,bkd->bqk"}> : () -> ()
    %cst_65 = arith.constant dense<0.000000e+00> : vector<2x8x8xf32>
    %231 = tpu.matmul %224, %227, %cst_65 {dimension_numbers = #tpu.dot_dimension_numbers<[2], [2], [1], [1], [0, 0, 0, 1, 1, 1], [0], [0]>} : vector<2x8x8xbf16>, vector<2x8x8xbf16>, vector<2x8x8xf32> -> vector<2x8x8xf32>
    "tpu.trace_stop"() : () -> ()
    %cst_66 = arith.constant dense<0xFF800000> : vector<2x8xf32>
    %232 = vector.multi_reduction <maximumf>, %231, %cst_66 [2] : vector<2x8x8xf32> to vector<2x8xf32>
    %233 = vector.shape_cast %232 : vector<2x8xf32> to vector<2x8x1xf32>
    %234 = vector.broadcast %233 : vector<2x8x1xf32> to vector<2x8x8xf32>
    %235 = arith.subf %231, %234 : vector<2x8x8xf32>
    %236 = math.exp %235 : vector<2x8x8xf32>
    %cst_67 = arith.constant dense<0.000000e+00> : vector<2x8xf32>
    %237 = vector.multi_reduction <add>, %236, %cst_67 [2] : vector<2x8x8xf32> to vector<2x8xf32>
    %238 = vector.shape_cast %237 : vector<2x8xf32> to vector<2x8x1xf32>
    %239 = vector.broadcast %238 : vector<2x8x1xf32> to vector<2x8x8xf32>
    %240 = arith.divf %236, %239 : vector<2x8x8xf32>
    %241 = arith.truncf %240 : vector<2x8x8xf32> to vector<2x8x8xbf16>
    "tpu.trace_start"() <{level = 10 : i32, message = "bqk,bkd->bqd"}> : () -> ()
    %cst_68 = arith.constant dense<0.000000e+00> : vector<2x8x8xf32>
    %242 = tpu.matmul %241, %230, %cst_68 {dimension_numbers = #tpu.dot_dimension_numbers<[2], [1], [1], [2], [0, 0, 0, 1, 1, 2], [0], [0]>} : vector<2x8x8xbf16>, vector<2x8x8xbf16>, vector<2x8x8xf32> -> vector<2x8x8xf32>
    "tpu.trace_stop"() : () -> ()
    %243 = vector.shape_cast %242 : vector<2x8x8xf32> to vector<16x8xf32>
    %244 = tpu.concatenate %177, %199, %221, %243 in 1 : vector<16x8xf32>, vector<16x8xf32>, vector<16x8xf32>, vector<16x8xf32> -> vector<16x32xf32>
    %245 = arith.truncf %244 : vector<16x32xf32> to vector<16x32xbf16>
    %c1_69 = arith.constant 1 : index
    %c0_70 = arith.constant 0 : index
    %c0_71 = arith.constant 0 : index
    %246 = vector.load %arg5[%c1_69, %c0_70, %c0_71] : memref<2x32x32xbf16, #tpu.memory_space<vmem>>, vector<1x32x32xbf16>
    %247 = vector.shape_cast %246 : vector<1x32x32xbf16> to vector<32x32xbf16>
    %cst_72 = arith.constant dense<0.000000e+00> : vector<16x32xf32>
    %248 = tpu.matmul %245, %247, %cst_72 {dimension_numbers = #tpu.dot_dimension_numbers<[1], [0], [0], [1], [0, 0, 1, 1], [], []>} : vector<16x32xbf16>, vector<32x32xbf16>, vector<16x32xf32> -> vector<16x32xf32>
    %c1_73 = arith.constant 1 : index
    %c0_74 = arith.constant 0 : index
    %c0_75 = arith.constant 0 : index
    %249 = vector.load %arg6[%c1_73, %c0_74, %c0_75] : memref<2x1x32xf32, #tpu.memory_space<vmem>>, vector<1x1x32xf32>
    %250 = vector.shape_cast %249 : vector<1x1x32xf32> to vector<1x32xf32>
    %251 = vector.broadcast %250 : vector<1x32xf32> to vector<16x32xf32>
    %252 = arith.addf %248, %251 : vector<16x32xf32>
    %253 = arith.addf %252, %147 : vector<16x32xf32>
    %cst_76 = arith.constant dense<0.000000e+00> : vector<16xf32>
    %254 = vector.multi_reduction <add>, %253, %cst_76 [1] : vector<16x32xf32> to vector<16xf32>
    %255 = vector.shape_cast %254 : vector<16xf32> to vector<16x1xf32>
    %cst_77 = arith.constant 3.200000e+01 : f32
    %256 = vector.broadcast %cst_77 : f32 to vector<16x1xf32>
    %257 = arith.divf %255, %256 : vector<16x1xf32>
    %258 = arith.mulf %253, %253 : vector<16x32xf32>
    %cst_78 = arith.constant dense<0.000000e+00> : vector<16xf32>
    %259 = vector.multi_reduction <add>, %258, %cst_78 [1] : vector<16x32xf32> to vector<16xf32>
    %260 = vector.shape_cast %259 : vector<16xf32> to vector<16x1xf32>
    %cst_79 = arith.constant 3.200000e+01 : f32
    %261 = vector.broadcast %cst_79 : f32 to vector<16x1xf32>
    %262 = arith.divf %260, %261 : vector<16x1xf32>
    %263 = arith.mulf %257, %257 : vector<16x1xf32>
    %264 = arith.subf %262, %263 : vector<16x1xf32>
    %265 = vector.broadcast %257 : vector<16x1xf32> to vector<16x32xf32>
    %266 = arith.subf %253, %265 : vector<16x32xf32>
    %cst_80 = arith.constant 9.99999996E-13 : f32
    %267 = vector.broadcast %cst_80 : f32 to vector<16x1xf32>
    %268 = arith.addf %264, %267 : vector<16x1xf32>
    %269 = math.rsqrt %268 : vector<16x1xf32>
    %270 = vector.broadcast %269 : vector<16x1xf32> to vector<16x32xf32>
    %271 = arith.mulf %266, %270 : vector<16x32xf32>
    %c1_81 = arith.constant 1 : index
    %c0_82 = arith.constant 0 : index
    %c0_83 = arith.constant 0 : index
    %272 = vector.load %arg7[%c1_81, %c0_82, %c0_83] : memref<2x1x32xf32, #tpu.memory_space<vmem>>, vector<1x1x32xf32>
    %273 = vector.shape_cast %272 : vector<1x1x32xf32> to vector<1x32xf32>
    %274 = vector.broadcast %273 : vector<1x32xf32> to vector<16x32xf32>
    %275 = arith.mulf %271, %274 : vector<16x32xf32>
    %c1_84 = arith.constant 1 : index
    %c0_85 = arith.constant 0 : index
    %c0_86 = arith.constant 0 : index
    %276 = vector.load %arg8[%c1_84, %c0_85, %c0_86] : memref<2x1x32xf32, #tpu.memory_space<vmem>>, vector<1x1x32xf32>
    %277 = vector.shape_cast %276 : vector<1x1x32xf32> to vector<1x32xf32>
    %278 = vector.broadcast %277 : vector<1x32xf32> to vector<16x32xf32>
    %279 = arith.addf %275, %278 : vector<16x32xf32>
    %280 = arith.truncf %279 : vector<16x32xf32> to vector<16x32xbf16>
    %c0_87 = arith.constant 0 : index
    %c0_88 = arith.constant 0 : index
    %281 = vector.load %arg9[%c0_87, %c0_88] : memref<32x128xbf16, #tpu.memory_space<vmem>>, vector<32x128xbf16>
    %cst_89 = arith.constant dense<0.000000e+00> : vector<16x128xf32>
    %282 = tpu.matmul %280, %281, %cst_89 {dimension_numbers = #tpu.dot_dimension_numbers<[1], [0], [0], [1], [0, 0, 1, 1], [], []>} : vector<16x32xbf16>, vector<32x128xbf16>, vector<16x128xf32> -> vector<16x128xf32>
    %c0_90 = arith.constant 0 : index
    %c0_91 = arith.constant 0 : index
    %283 = vector.load %arg10[%c0_90, %c0_91] : memref<1x128xf32, #tpu.memory_space<vmem>>, vector<1x128xf32>
    %284 = vector.broadcast %283 : vector<1x128xf32> to vector<16x128xf32>
    %285 = arith.addf %282, %284 : vector<16x128xf32>
    %c0_92 = arith.constant 0 : index
    %c0_93 = arith.constant 0 : index
    %286 = vector.load %arg11[%c0_92, %c0_93] : memref<16x128xf32, #tpu.memory_space<vmem>>, vector<16x128xf32>
    tpu.vector_store %arg11[%c0_92, %c0_93], %285 {strides = array<i32>} : memref<16x128xf32, #tpu.memory_space<vmem>>, vector<16x128xf32>,
    return
  }
}

</mosaic_0001>

<bundles_post_ra>
// kernel: ingredient_parser_forward.1
= control target key start
LH: loop header
LB: loop body
LE: loop exit
PB: predicated region body
PF: predicated region fallthrough
CT: control target
= control target key end

     0   :  { %v2999_v0 = vmov 0   ;;  %v3000_v10 = vmov 0.0   ;;  %vm87_vm0 = vcmask 1041408   ;;  %v39_v17 = vlaneseq  ;;  %s3002_s23 = smov 96   ;;  %s3003_s24 = smov 64   ;;  %s3565_s0 = inlined_call_operand.vmem [shape: s32[16,1], index: 0, kind: input, shape index: {}]   ;;  %s3566_s1 = inlined_call_operand.vmem [shape: s32[16,1], index: 1, kind: input, shape index: {}]   ;;  %s3567_s2 = inlined_call_operand.vmem [shape: f32[50,32], index: 2, kind: input, shape index: {}]   ;;  %s3568_s3 = inlined_call_operand.vmem [shape: bf16[2,32,96], index: 3, kind: input, shape index: {}]   ;;  %s3569_s4 = inlined_call_operand.vmem [shape: f32[2,1,96], index: 4, kind: input, shape index: {}]   ;;  %s3570_s5 = inlined_call_operand.vmem [shape: bf16[2,32,32], index: 5, kind: input, shape index: {}]   ;;  %s3571_s6 = inlined_call_operand.vmem [shape: f32[2,1,32], index: 6, kind: input, shape index: {}]   ;;  %s3572_s7 = inlined_call_operand.vmem [shape: f32[2,1,32], index: 7, kind: input, shape index: {}]   ;;  %s3573_s8 = inlined_call_operand.vmem [shape: f32[2,1,32], index: 8, kind: input, shape index: {}]   ;;  %s3574_s9 = inlined_call_operand.vmem [shape: bf16[32,128], index: 9, kind: input, shape index: {}]   ;;  %s3575_s10 = inlined_call_operand.vmem [shape: f32[1,128], index: 10, kind: input, shape index: {}]   ;;  %s3576_s11 = inlined_call_operand.vmem [shape: f32[16,128], index: 11, kind: output, shape index: {}]  }
   0x1   :  { %2886 = vset.pattern.permute.xlu1 %v2999_v0  ;;  %2885 = vset.pattern.permute.xlu0 %v2999_v0  ;;  %v42_v1 = vld [vmem:[%s3565_s0 + $0x8] sm:$0xff]  ;;  %v41_v2 = vld [vmem:[%s3565_s0] sm:$0xff]  ;;  %v75_v8 = vld [vmem:[%s3567_s2 + $0x10] sm:$0xff]  ;;  %vm80_vm5 = vcmask 408576   ;;  %vm3001_vm6 = vmmov 0   ;;  %vm190_vm7 = vcmask 261120  }
   0x2   :  { %47 = vperm.xlu1 %2886, %v42_v1   ;;  %44 = vperm.xlu0 %2885, %v41_v2   ;;  %v56_v3 = vld [vmem:[%s3566_s1 + $0x8] sm:$0xff]  ;;  %v73_v4 = vld [vmem:[%s3567_s2] sm:$0xff]  ;;  %v76_v9 = vld [vmem:[%s3567_s2 + $0x18] sm:$0xff]  ;;  %v40_v18 = vand.u32 127, %v39_v17  ;;  %vm240_vm8 = vcmask 64512   ;;  %s3004_s25 = smov 88  }
   0x3   :  { %v74_v5 = vld [vmem:[%s3567_s2 + $0x8] sm:$0xff]  ;;  %v55_v6 = vld [vmem:[%s3566_s1] sm:$0xff]  ;;  %2624 = vmatprep.subr.bf16.mxu1 %v3000_v10  ;;  %v2860_v11 = vpack.c.bf16 %v76_v9, %v75_v8  ;;  %v79_v15 = vld [vmem:[%s3567_s2 + $0x30] sm:$0x3]  ;;  %2628 = vmatprep.mubr.msk.bf16.mxu1 %vm3001_vm6, %v3000_v10  ;;  %s3005_s26 = smov 120   ;;  %vm365_vm9 = vcmask 1043456  }
   0x4   :  { %v2856_v7 = vpack.c.bf16 %v74_v5, %v73_v4  ;;  %v77_v12 = vld [vmem:[%s3567_s2 + $0x20] sm:$0xff]  ;;  %v78_v13 = vld [vmem:[%s3567_s2 + $0x28] sm:$0xff]  ;;  %s3006_s27 = smov 56   ;;  %s3007_s28 = smov 80   ;;  %vm1143_vm10 = vcmask 130048   ;;  %vm1146_vm11 = vcmask 195584  }
   0x5   :  { %v2864_v14 = vpack.c.bf16 %v78_v13, %v77_v12  ;;  %v2917_v16 = vld [vmem:[%s3568_s3] sm:$0xff]   ;;  %v2918_v31 = vld [vmem:[%s3568_s3 + $0x8] sm:$0xff]   ;;  %s3008_s0 = smov 112   ;;  %s3009_s29 = smov 48  }
   0x6   :  { %2857 = vmatprep.subr.bf16.mxu0 %v2856_v7  ;;  %61 = vperm.xlu1 %2886, %v56_v3   ;;  %v2451_v35 = vld [vmem:[%s3569_s4] ss:$0 sm:$0xff]  ;;  %s3010_s30 = smov 72   ;;  %s3011_s12 = smov 104  }
   0x7   :  { %58 = vperm.xlu0 %2885, %v55_v6   ;;  %2859 = vmatpush3.bf16.msra.mxu0 %v2856_v7  ;;  %s3012_s13 = smov 40   ;;  %s3013_s14 = smov 8  }
   0x8   :  { %2861 = vmatprep.subr.bf16.mxu0 %v2860_v11  ;;  %2625 = vmatpush3.bf16.msra.mxu1 %v2917_v16  ;;  %s3014_s15 = smov 16   ;;  %s3015_s19 = smov 24  }
   0x9   :  { %2626 = vmatprep.subr.bf16.mxu1 %v3000_v10 }
   0xb   :  { %2863 = vmatpush3.bf16.msra.mxu0 %v2860_v11 }
   0xc   :  { %2865 = vmatprep.subr.bf16.mxu0 %v2864_v14  ;;  %2627 = vmatpush3.bf16.msra.mxu1 %v2918_v31 }
   0xd   :  { %2632 = vmatprep.subr.bf16.mxu1 %v3000_v10 }
   0xf   :  { %2867 = vmatpush3.bf16.msra.mxu0 %v2864_v14 }
  0x10   :  { %2619 = vmatprep.subr.msk.mxu0 %vm87_vm0, %v79_v15 }
  0x13   :  { %2620 = vmatpush3.msk.msra.mxu0 %vm87_vm0, %v79_v15 }
  0x14   :  { %2638 = vmatprep.subr.bf16.mxu0 %v3000_v10 }
  0x81   :  { %v48_v19 = vpop.permute.xlu1 %47  ;;  %v45_v20 = vpop.permute.xlu0 %44 }
  0x82   :  { %vm50_vm1 = vcmp.eq.s32.totalorder %v40_v18, %v48_v19  ;;  %vm49_vm2 = vcmp.eq.s32.totalorder %v40_v18, %v45_v20 }
  0x83   :  { %v2445_v23 = vsel %vm50_vm1, 1.0, %v3000_v10  ;;  %v2444_v24 = vsel %vm49_vm2, 1.0, %v3000_v10 }
  0x85   :  { %v62_v21 = vpop.permute.xlu1 %61 }
  0x86   :  { %v59_v22 = vpop.permute.xlu0 %58  ;;  %vm64_vm3 = vcmp.eq.s32.totalorder %v40_v18, %v62_v21 }
  0x87   :  { %vm63_vm4 = vcmp.eq.s32.totalorder %v40_v18, %v59_v22  ;;  %v2447_v25 = vsel %vm64_vm3, 1.0, %v3000_v10 }
  0x88   :  { %v2446_v26 = vsel %vm63_vm4, 1.0, %v3000_v10  ;;  %v70_v27 = vadd.f32 %v2447_v25, %v2445_v23 }
  0x89   :  { %v69_v28 = vadd.f32 %v2446_v26, %v2444_v24 }
  0x8a   :  { %v72_v29 = vmul.f32 0.5, %v70_v27 }
  0x8b   :  { %v71_v30 = vmul.f32 0.5, %v69_v28 }
  0x8d   :  { %2621 = vmatprep.mubr.msk.f32.mxu0 %vm80_vm5, %v71_v30 }
  0x8e   :  { %2622 = vmatmul.mubr.msk.f32.vlgmr.msra.gmra.mrb[0].mxu0 %vm80_vm5, %v72_v29 }
  0x8f   :  { %2640 = vmatprep.mubr.msk.bf16.mxu0 %vm3001_vm6, %v3000_v10 }
 0x161   :  { %v3127_v32 = vpop.f32.mrb[0].mxu0 }
 0x162   :  { %v3129_v33 = vpop.f32.mrb[1].mxu0 }
 0x163   :  { %v166_v34 = vpack.c.bf16 %v3127_v32, %v3129_v33 }
 0x165   :  { %2629 = vmatmul.mubr.msk.bf16.vlgmr.msra.gmra.mrb[0].mxu1 %vm190_vm7, %v166_v34 }
 0x166   :  { %2634 = vmatprep.mubr.msk.bf16.mxu1 %vm3001_vm6, %v3000_v10 }
 0x238   :  { %v228_v36 = vpop.f32.mrb[0].mxu1 }
 0x239   :  { %v229_v37 = vadd.f32 %v2451_v35, %v228_v36  ;;  %v2630_v38 = vpop.f32.mrb[1].mxu1 }
 0x23a   :  { %v231_v39 = vpop.f32.mrb[2].mxu1 }
 0x23b   :  { %v3139_v40 = vpack.c.bf16 %v229_v37, %v229_v37  ;;  %v232_v41 = vadd.f32 %v2451_v35, %v231_v39  ;;  %v2631_v42 = vpop.f32.mrb[3].mxu1 }
 0x23d   :  { %v3141_v43 = vpack.c.bf16 %v232_v41, %v232_v41  ;;  %238 = vrot.lane.b32.xlu0 %v3139_v40, %s3002_s23 }
 0x23f   :  { %288 = vrot.lane.b32.xlu1 %v3141_v43, %s3002_s23 }
 0x2af   :  { %v239_v44 = vpop.permute.xlu0 %238 }
 0x2b0   :  { %v245_v45 = vsel %vm240_vm8, %v239_v44, 0 }
 0x2b1   :  { %2633 = vmatpush3.bf16.xpose.msra.mxu1 %v245_v45  ;;  %v289_v46 = vpop.permute.xlu1 %288 }
 0x2b2   :  { %v294_v47 = vsel %vm240_vm8, %v289_v46, 0  ;;  %2644 = vmatprep.subr.bf16.mxu1 %v3000_v10 }
 0x2b3   :  { %2639 = vmatpush3.bf16.xpose.msra.mxu0 %v294_v47 }
 0x2b4   :  { %2650 = vmatprep.subr.bf16.mxu0 %v3000_v10 }
 0x2b8   :  { %2635 = vmatmul.mubr.msk.bf16.vlgmr.msra.gmra.mrb[4].mxu1 %vm240_vm8, %v3139_v40 }
 0x2b9   :  { %2646 = vmatprep.mubr.msk.bf16.mxu1 %vm3001_vm6, %v3000_v10 }
 0x2ba   :  { %2641 = vmatmul.mubr.msk.bf16.vlgmr.msra.gmra.mrb[4].mxu0 %vm240_vm8, %v3141_v43 }
 0x2bb   :  { %2652 = vmatprep.mubr.msk.bf16.mxu0 %vm3001_vm6, %v3000_v10 }
 0x38b   :  { %v281_v48 = vpop.f32.mrb[4].mxu1 }
 0x38c   :  { %v2636_v49 = vpop.f32.mrb[5].mxu1  ;;  %v336_v50 = vsel %vm240_vm8, %v281_v48, -inf }
 0x38d   :  { %v330_v51 = vpop.f32.mrb[4].mxu0  ;;  %337 = vmax.xlane.f32.xlu0 %v336_v50  ;;  %v284_v52 = vpop.f32.mrb[6].mxu1 }
 0x38e   :  { %v2637_v53 = vpop.f32.mrb[7].mxu1  ;;  %v2642_v54 = vpop.f32.mrb[5].mxu0  ;;  %v339_v55 = vsel %vm240_vm8, %v330_v51, -inf }
 0x38f   :  { %340 = vmax.xlane.f32.xlu1 %v339_v55  ;;  %v333_v56 = vpop.f32.mrb[6].mxu0 }
 0x390   :  { %v2643_v57 = vpop.f32.mrb[7].mxu0 }
 0x3a0   :  { %360 = vrot.lane.b32.xlu1 %v3139_v40, %s3003_s24 }
 0x3a4   :  { %459 = vrot.lane.b32.xlu1 %v3139_v40, %s3004_s25 }
 0x3a8   :  { %509 = vrot.lane.b32.xlu1 %v3141_v43, %s3004_s25 }
 0x3ac   :  { %507 = vrot.lane.b32.xlu1 %v3141_v43, %s3005_s26 }
 0x41a   :  { %v338_v58 = vpop.xlane.xlu0 %337 }
 0x41b   :  { %v342_v59 = vsub.f32 %v281_v48, %v338_v58 }
 0x41c   :  { %v341_v60 = vpop.xlane.xlu1 %340 }
 0x41d   :  { %v344_v61 = vmul.f32 1.442695, %v342_v59  ;;  %v343_v62 = vsub.f32 %v330_v51, %v341_v60 }
 0x41f   :  { %2927 = vpow2.f32 %v344_v61  ;;  %v346_v63 = vmul.f32 1.442695, %v343_v62 }
 0x420   :  { %v361_v0 = vpop.permute.xlu1 %360 }
 0x421   :  { %2929 = vpow2.f32 %v346_v63  ;;  %v367_v1 = vsel %vm365_vm9, %v361_v0, 0 }
 0x422   :  { %2645 = vmatpush3.bf16.msra.mxu1 %v367_v1 }
 0x423   :  { %2656 = vmatprep.subr.bf16.mxu1 %v3000_v10 }
 0x424   :  { %v460_v12 = vpop.permute.xlu1 %459 }
 0x425   :  { %v465_v16 = vsel %vm240_vm8, %v460_v12, 0 }
 0x428   :  { %v510_v18 = vpop.permute.xlu1 %509 }
 0x429   :  { %v2928_v2 = vpop.eup %2927  ;;  %v515_v20 = vsel %vm240_vm8, %v510_v18, 0 }
 0x42a   :  { %v348_v3 = vsel %vm240_vm8, %v2928_v2, 0.0 }
 0x42b   :  { %v2930_v4 = vpop.eup %2929  ;;  %349 = vadd.xlane.f32.xlu0 %v348_v3 }
 0x42c   :  { %v351_v5 = vsel %vm240_vm8, %v2930_v4, 0.0  ;;  %v508_v22 = vpop.permute.xlu1 %507 }
 0x42f   :  { %352 = vadd.xlane.f32.xlu0 %v351_v5 }
 0x445   :  { %409 = vrot.lane.b32.xlu0 %v3141_v43, %s3003_s24 }
 0x449   :  { %457 = vrot.lane.b32.xlu0 %v3139_v40, %s3005_s26 }
 0x4b8   :  { %v350_v6 = vpop.xlane.xlu0 %349 }
 0x4b9   :  { %2931 = vrcp.f32 %v350_v6 }
 0x4bc   :  { %v353_v7 = vpop.xlane.xlu0 %352 }
 0x4bd   :  { %2933 = vrcp.f32 %v353_v7 }
 0x4c0   :  { %v410_v8 = vpop.permute.xlu0 %409 }
 0x4c1   :  { %v415_v9 = vsel %vm365_vm9, %v410_v8, 0 }
 0x4c2   :  { %2651 = vmatpush3.bf16.msra.mxu0 %v415_v9 }
 0x4c3   :  { %v2932_v11 = vpop.eup %2931  ;;  %2662 = vmatprep.subr.bf16.mxu0 %v3000_v10 }
 0x4c4   :  { %v355_v13 = vmul.f32 %v2932_v11, %v2928_v2  ;;  %v458_v21 = vpop.permute.xlu0 %457 }
 0x4c6   :  { %v358_v14 = vpack.c.bf16 %v355_v13, %v355_v13 }
 0x4c7   :  { %v2934_v15 = vpop.eup %2933 }
 0x4c8   :  { %v357_v17 = vmul.f32 %v2934_v15, %v2930_v4  ;;  %2647 = vmatmul.mubr.msk.bf16.vlgmr.msra.gmra.mrb[8].mxu1 %vm240_vm8, %v358_v14 }
 0x4c9   :  { %2657 = vmatpush3.bf16.xpose.msra.mxu1 %v465_v16  ;;  %2658 = vmatprep.mubr.msk.bf16.mxu1 %vm3001_vm6, %v3000_v10 }
 0x4ca   :  { %v359_v19 = vpack.c.bf16 %v357_v17, %v357_v17  ;;  %2668 = vmatprep.subr.bf16.mxu1 %v3000_v10 }
 0x4cc   :  { %2653 = vmatmul.mubr.msk.bf16.vlgmr.msra.gmra.mrb[8].mxu0 %vm240_vm8, %v359_v19 }
 0x4cd   :  { %2663 = vmatpush3.bf16.xpose.msra.mxu0 %v515_v20  ;;  %2664 = vmatprep.mubr.msk.bf16.mxu0 %vm3001_vm6, %v3000_v10 }
 0x4ce   :  { %2674 = vmatprep.subr.bf16.mxu0 %v3000_v10 }
 0x4d0   :  { %2659 = vmatmul.mubr.msk.bf16.vlgmr.msra.gmra.mrb[12].mxu1 %vm240_vm8, %v458_v21 }
 0x4d1   :  { %2670 = vmatprep.mubr.msk.bf16.mxu1 %vm3001_vm6, %v3000_v10 }
 0x4d4   :  { %2665 = vmatmul.mubr.msk.bf16.vlgmr.msra.gmra.mrb[12].mxu0 %vm240_vm8, %v508_v22 }
 0x4d5   :  { %2676 = vmatprep.mubr.msk.bf16.mxu0 %vm3001_vm6, %v3000_v10 }
 0x59b   :  { %v3195_v23 = vpop.f32.mrb[8].mxu1 }
 0x59c   :  { %v2648_v24 = vpop.f32.mrb[9].mxu1 }
 0x59d   :  { %v406_v25 = vpop.f32.mrb[10].mxu1 }
 0x59e   :  { %v2649_v26 = vpop.f32.mrb[11].mxu1 }
 0x59f   :  { %v3197_v27 = vpop.f32.mrb[8].mxu0 }
 0x5a0   :  { %v2654_v28 = vpop.f32.mrb[9].mxu0 }
 0x5a1   :  { %v454_v29 = vpop.f32.mrb[10].mxu0 }
 0x5a2   :  { %v2655_v30 = vpop.f32.mrb[11].mxu0 }
 0x5a3   :  { %v501_v31 = vpop.f32.mrb[12].mxu1 }
 0x5a4   :  { %v2660_v34 = vpop.f32.mrb[13].mxu1  ;;  %v557_v35 = vsel %vm240_vm8, %v501_v31, -inf }
 0x5a5   :  { %558 = vmax.xlane.f32.xlu0 %v557_v35  ;;  %v504_v36 = vpop.f32.mrb[14].mxu1 }
 0x5a6   :  { %v2661_v37 = vpop.f32.mrb[15].mxu1 }
 0x5a7   :  { %v551_v38 = vpop.f32.mrb[12].mxu0 }
 0x5a8   :  { %v2666_v39 = vpop.f32.mrb[13].mxu0  ;;  %v560_v41 = vsel %vm240_vm8, %v551_v38, -inf }
 0x5a9   :  { %561 = vmax.xlane.f32.xlu1 %v560_v41  ;;  %v554_v42 = vpop.f32.mrb[14].mxu0 }
 0x5aa   :  { %v2667_v44 = vpop.f32.mrb[15].mxu0 }
 0x5ba   :  { %581 = vrot.lane.b32.xlu1 %v3139_v40, %s3006_s27 }
 0x5be   :  { %679 = vrot.lane.b32.xlu1 %v3139_v40, %s3007_s28 }
 0x5c2   :  { %729 = vrot.lane.b32.xlu1 %v3141_v43, %s3007_s28 }
 0x5c6   :  { %727 = vrot.lane.b32.xlu1 %v3141_v43, %s3008_s0 }
 0x632   :  { %v559_v45 = vpop.xlane.xlu0 %558 }
 0x633   :  { %v563_v46 = vsub.f32 %v501_v31, %v559_v45 }
 0x635   :  { %v565_v47 = vmul.f32 1.442695, %v563_v46 }
 0x636   :  { %v562_v48 = vpop.xlane.xlu1 %561 }
 0x637   :  { %2935 = vpow2.f32 %v565_v47  ;;  %v564_v49 = vsub.f32 %v551_v38, %v562_v48 }
 0x639   :  { %v567_v50 = vmul.f32 1.442695, %v564_v49 }
 0x63a   :  { %v582_v51 = vpop.permute.xlu1 %581 }
 0x63b   :  { %2937 = vpow2.f32 %v567_v50  ;;  %v587_v52 = vsel %vm365_vm9, %v582_v51, 0 }
 0x63c   :  { %2669 = vmatpush3.bf16.msra.mxu1 %v587_v52 }
 0x63d   :  { %2680 = vmatprep.subr.bf16.mxu1 %v3000_v10 }
 0x63e   :  { %v680_v62 = vpop.permute.xlu1 %679 }
 0x63f   :  { %v685_v2 = vsel %vm240_vm8, %v680_v62, 0 }
 0x641   :  { %v2936_v53 = vpop.eup %2935 }
 0x642   :  { %v569_v54 = vsel %vm240_vm8, %v2936_v53, 0.0  ;;  %v730_v4 = vpop.permute.xlu1 %729 }
 0x643   :  { %570 = vadd.xlane.f32.xlu0 %v569_v54  ;;  %v735_v6 = vsel %vm240_vm8, %v730_v4, 0 }
 0x645   :  { %v2938_v55 = vpop.eup %2937 }
 0x646   :  { %v572_v56 = vsel %vm240_vm8, %v2938_v55, 0.0  ;;  %v728_v8 = vpop.permute.xlu1 %727 }
 0x647   :  { %573 = vadd.xlane.f32.xlu0 %v572_v56 }
 0x65d   :  { %629 = vrot.lane.b32.xlu0 %v3141_v43, %s3006_s27 }
 0x661   :  { %677 = vrot.lane.b32.xlu0 %v3139_v40, %s3008_s0 }
 0x6d0   :  { %v571_v57 = vpop.xlane.xlu0 %570 }
 0x6d1   :  { %2939 = vrcp.f32 %v571_v57 }
 0x6d4   :  { %v574_v58 = vpop.xlane.xlu0 %573 }
 0x6d5   :  { %2941 = vrcp.f32 %v574_v58 }
 0x6d8   :  { %v630_v59 = vpop.permute.xlu0 %629 }
 0x6d9   :  { %v635_v60 = vsel %vm365_vm9, %v630_v59, 0 }
 0x6da   :  { %2675 = vmatpush3.bf16.msra.mxu0 %v635_v60 }
 0x6db   :  { %v2940_v61 = vpop.eup %2939  ;;  %2686 = vmatprep.subr.bf16.mxu0 %v3000_v10 }
 0x6dc   :  { %v576_v63 = vmul.f32 %v2940_v61, %v2936_v53  ;;  %v678_v7 = vpop.permute.xlu0 %677 }
 0x6de   :  { %v579_v0 = vpack.c.bf16 %v576_v63, %v576_v63 }
 0x6df   :  { %v2942_v1 = vpop.eup %2941 }
 0x6e0   :  { %v578_v3 = vmul.f32 %v2942_v1, %v2938_v55  ;;  %2671 = vmatmul.mubr.msk.bf16.vlgmr.msra.gmra.mrb[16].mxu1 %vm240_vm8, %v579_v0 }
 0x6e1   :  { %2681 = vmatpush3.bf16.xpose.msra.mxu1 %v685_v2  ;;  %2682 = vmatprep.mubr.msk.bf16.mxu1 %vm3001_vm6, %v3000_v10 }
 0x6e2   :  { %v580_v5 = vpack.c.bf16 %v578_v3, %v578_v3  ;;  %2692 = vmatprep.subr.bf16.mxu1 %v3000_v10 }
 0x6e4   :  { %2677 = vmatmul.mubr.msk.bf16.vlgmr.msra.gmra.mrb[16].mxu0 %vm240_vm8, %v580_v5 }
 0x6e5   :  { %2687 = vmatpush3.bf16.xpose.msra.mxu0 %v735_v6  ;;  %2688 = vmatprep.mubr.msk.bf16.mxu0 %vm3001_vm6, %v3000_v10 }
 0x6e6   :  { %2698 = vmatprep.subr.bf16.mxu0 %v3000_v10 }
 0x6e8   :  { %2683 = vmatmul.mubr.msk.bf16.vlgmr.msra.gmra.mrb[20].mxu1 %vm240_vm8, %v678_v7 }
 0x6e9   :  { %2694 = vmatprep.mubr.msk.bf16.mxu1 %vm3001_vm6, %v3000_v10 }
 0x6ec   :  { %2689 = vmatmul.mubr.msk.bf16.vlgmr.msra.gmra.mrb[20].mxu0 %vm240_vm8, %v728_v8 }
 0x6ed   :  { %2700 = vmatprep.mubr.msk.bf16.mxu0 %vm3001_vm6, %v3000_v10 }
 0x7b3   :  { %v3235_v9 = vpop.f32.mrb[16].mxu1 }
 0x7b4   :  { %v2672_v11 = vpop.f32.mrb[17].mxu1 }
 0x7b5   :  { %v626_v12 = vpop.f32.mrb[18].mxu1 }
 0x7b6   :  { %v2673_v13 = vpop.f32.mrb[19].mxu1 }
 0x7b7   :  { %v3237_v14 = vpop.f32.mrb[16].mxu0 }
 0x7b8   :  { %v2887_v15 = vpack.i.bf16 %v3237_v14, %v3235_v9  ;;  %v2678_v16 = vpop.f32.mrb[17].mxu0 }
 0x7b9   :  { %v674_v17 = vpop.f32.mrb[18].mxu0 }
 0x7ba   :  { %v2679_v18 = vpop.f32.mrb[19].mxu0 }
 0x7bb   :  { %v721_v19 = vpop.f32.mrb[20].mxu1 }
 0x7bc   :  { %v2684_v20 = vpop.f32.mrb[21].mxu1  ;;  %v777_v21 = vsel %vm240_vm8, %v721_v19, -inf }
 0x7bd   :  { %778 = vmax.xlane.f32.xlu0 %v777_v21  ;;  %v724_v22 = vpop.f32.mrb[22].mxu1 }
 0x7be   :  { %v2685_v24 = vpop.f32.mrb[23].mxu1 }
 0x7bf   :  { %v771_v25 = vpop.f32.mrb[20].mxu0 }
 0x7c0   :  { %v2690_v26 = vpop.f32.mrb[21].mxu0  ;;  %v780_v28 = vsel %vm240_vm8, %v771_v25, -inf }
 0x7c1   :  { %781 = vmax.xlane.f32.xlu1 %v780_v28  ;;  %v774_v29 = vpop.f32.mrb[22].mxu0 }
 0x7c2   :  { %v2691_v30 = vpop.f32.mrb[23].mxu0 }
 0x7d2   :  { %801 = vrot.lane.b32.xlu1 %v3139_v40, %s3009_s29 }
 0x7d6   :  { %899 = vrot.lane.b32.xlu1 %v3139_v40, %s3010_s30 }
 0x7da   :  { %949 = vrot.lane.b32.xlu1 %v3141_v43, %s3010_s30 }
 0x7de   :  { %947 = vrot.lane.b32.xlu1 %v3141_v43, %s3011_s12 }
 0x84a   :  { %v779_v31 = vpop.xlane.xlu0 %778 }
 0x84b   :  { %v783_v34 = vsub.f32 %v721_v19, %v779_v31 }
 0x84d   :  { %v785_v35 = vmul.f32 1.442695, %v783_v34 }
 0x84e   :  { %v782_v36 = vpop.xlane.xlu1 %781 }
 0x84f   :  { %2943 = vpow2.f32 %v785_v35  ;;  %v784_v37 = vsub.f32 %v771_v25, %v782_v36 }
 0x851   :  { %v787_v38 = vmul.f32 1.442695, %v784_v37 }
 0x852   :  { %v802_v39 = vpop.permute.xlu1 %801 }
 0x853   :  { %2945 = vpow2.f32 %v787_v38  ;;  %v807_v41 = vsel %vm365_vm9, %v802_v39, 0 }
 0x854   :  { %2693 = vmatpush3.bf16.msra.mxu1 %v807_v41 }
 0x855   :  { %2704 = vmatprep.subr.bf16.mxu1 %v3000_v10 }
 0x856   :  { %v900_v52 = vpop.permute.xlu1 %899 }
 0x857   :  { %v905_v56 = vsel %vm240_vm8, %v900_v52, 0 }
 0x859   :  { %v2944_v42 = vpop.eup %2943 }
 0x85a   :  { %v789_v44 = vsel %vm240_vm8, %v2944_v42, 0.0  ;;  %v950_v58 = vpop.permute.xlu1 %949 }
 0x85b   :  { %790 = vadd.xlane.f32.xlu0 %v789_v44  ;;  %v955_v60 = vsel %vm240_vm8, %v950_v58, 0 }
 0x85d   :  { %v2946_v45 = vpop.eup %2945 }
 0x85e   :  { %v792_v46 = vsel %vm240_vm8, %v2946_v45, 0.0  ;;  %v948_v62 = vpop.permute.xlu1 %947 }
 0x85f   :  { %793 = vadd.xlane.f32.xlu0 %v792_v46  ;;  %v2920_v46 = vld [vmem:[%s3570_s5 + $0x8] sm:$0xff]  }
 0x875   :  { %849 = vrot.lane.b32.xlu0 %v3141_v43, %s3009_s29 }
 0x879   :  { %897 = vrot.lane.b32.xlu0 %v3139_v40, %s3011_s12 }
 0x8e8   :  { %v791_v47 = vpop.xlane.xlu0 %790 }
 0x8e9   :  { %2947 = vrcp.f32 %v791_v47 }
 0x8ec   :  { %v794_v48 = vpop.xlane.xlu0 %793 }
 0x8ed   :  { %2949 = vrcp.f32 %v794_v48 }
 0x8f0   :  { %v850_v49 = vpop.permute.xlu0 %849 }
 0x8f1   :  { %v855_v50 = vsel %vm365_vm9, %v850_v49, 0 }
 0x8f2   :  { %2699 = vmatpush3.bf16.msra.mxu0 %v855_v50 }
 0x8f3   :  { %v2948_v51 = vpop.eup %2947  ;;  %2710 = vmatprep.subr.bf16.mxu0 %v3000_v10 }
 0x8f4   :  { %v796_v53 = vmul.f32 %v2948_v51, %v2944_v42  ;;  %v898_v61 = vpop.permute.xlu0 %897 }
 0x8f6   :  { %v799_v54 = vpack.c.bf16 %v796_v53, %v796_v53 }
 0x8f7   :  { %v2950_v55 = vpop.eup %2949 }
 0x8f8   :  { %v798_v57 = vmul.f32 %v2950_v55, %v2946_v45  ;;  %2695 = vmatmul.mubr.msk.bf16.vlgmr.msra.gmra.mrb[24].mxu1 %vm240_vm8, %v799_v54  ;;  %v2919_v45 = vld [vmem:[%s3570_s5] sm:$0xff]  }
 0x8f9   :  { %2705 = vmatpush3.bf16.xpose.msra.mxu1 %v905_v56  ;;  %2706 = vmatprep.mubr.msk.bf16.mxu1 %vm3001_vm6, %v3000_v10 }
 0x8fa   :  { %v800_v59 = vpack.c.bf16 %v798_v57, %v798_v57  ;;  %2716 = vmatprep.subr.bf16.mxu1 %v3000_v10 }
 0x8fc   :  { %2701 = vmatmul.mubr.msk.bf16.vlgmr.msra.gmra.mrb[24].mxu0 %vm240_vm8, %v800_v59 }
 0x8fd   :  { %2711 = vmatpush3.bf16.xpose.msra.mxu0 %v955_v60  ;;  %2712 = vmatprep.mubr.msk.bf16.mxu0 %vm3001_vm6, %v3000_v10 }
 0x8fe   :  { %2722 = vmatprep.subr.bf16.mxu0 %v3000_v10 }
 0x900   :  { %2707 = vmatmul.mubr.msk.bf16.vlgmr.msra.gmra.mrb[28].mxu1 %vm240_vm8, %v898_v61 }
 0x901   :  { %2718 = vmatprep.mubr.msk.bf16.mxu1 %vm3001_vm6, %v3000_v10 }
 0x904   :  { %2713 = vmatmul.mubr.msk.bf16.vlgmr.msra.gmra.mrb[28].mxu0 %vm240_vm8, %v948_v62 }
 0x905   :  { %2724 = vmatprep.mubr.msk.bf16.mxu0 %vm3001_vm6, %v3000_v10 }
 0x9cb   :  { %v843_v63 = vpop.f32.mrb[24].mxu1 }
 0x9cc   :  { %v2696_v0 = vpop.f32.mrb[25].mxu1 }
 0x9cd   :  { %v846_v1 = vpop.f32.mrb[26].mxu1 }
 0x9ce   :  { %v2697_v2 = vpop.f32.mrb[27].mxu1 }
 0x9cf   :  { %v891_v3 = vpop.f32.mrb[24].mxu0 }
 0x9d0   :  { %v2892_v4 = vpack.i.bf16 %v891_v3, %v843_v63  ;;  %v2702_v5 = vpop.f32.mrb[25].mxu0 }
 0x9d1   :  { %v894_v6 = vpop.f32.mrb[26].mxu0 }
 0x9d2   :  { %v2703_v7 = vpop.f32.mrb[27].mxu0 }
 0x9d3   :  { %v941_v8 = vpop.f32.mrb[28].mxu1 }
 0x9d4   :  { %v2708_v11 = vpop.f32.mrb[29].mxu1  ;;  %v997_v12 = vsel %vm240_vm8, %v941_v8, -inf }
 0x9d5   :  { %998 = vmax.xlane.f32.xlu0 %v997_v12  ;;  %v944_v13 = vpop.f32.mrb[30].mxu1 }
 0x9d6   :  { %v2709_v16 = vpop.f32.mrb[31].mxu1 }
 0x9d7   :  { %v991_v17 = vpop.f32.mrb[28].mxu0 }
 0x9d8   :  { %v2714_v18 = vpop.f32.mrb[29].mxu0  ;;  %v1000_v19 = vsel %vm240_vm8, %v991_v17, -inf }
 0x9d9   :  { %1001 = vmax.xlane.f32.xlu1 %v1000_v19  ;;  %v994_v20 = vpop.f32.mrb[30].mxu0 }
 0x9da   :  { %v2715_v21 = vpop.f32.mrb[31].mxu0 }
 0x9ea   :  { %1021 = vrot.lane.b32.xlu1 %v3139_v40, %s3012_s13 }
 0x9ee   :  { %2888 = vrot.lane.b32.xlu1 %v2887_v15, %s3013_s14 }
 0x9f2   :  { %2893 = vrot.lane.b32.xlu1 %v2892_v4, %s3014_s15 }
 0xa62   :  { %v999_v22 = vpop.xlane.xlu0 %998 }
 0xa63   :  { %v1003_v24 = vsub.f32 %v941_v8, %v999_v22 }
 0xa65   :  { %v1005_v25 = vmul.f32 1.442695, %v1003_v24 }
 0xa66   :  { %v1002_v26 = vpop.xlane.xlu1 %1001 }
 0xa67   :  { %2951 = vpow2.f32 %v1005_v25  ;;  %v1004_v28 = vsub.f32 %v991_v17, %v1002_v26 }
 0xa69   :  { %v1007_v29 = vmul.f32 1.442695, %v1004_v28 }
 0xa6a   :  { %v1022_v30 = vpop.permute.xlu1 %1021 }
 0xa6b   :  { %2953 = vpow2.f32 %v1007_v29  ;;  %v1027_v40 = vsel %vm365_vm9, %v1022_v30, 0 }
 0xa6c   :  { %2717 = vmatpush3.bf16.msra.mxu1 %v1027_v40 }
 0xa6d   :  { %2728 = vmatprep.subr.bf16.mxu1 %v3000_v10 }
 0xa6e   :  { %v2889_v56 = vpop.permute.xlu1 %2888 }
 0xa6f   :  { %v2891_v58 = vunpack.i.h.bf16 %v2889_v56  ;;  %v2890_v59 = vunpack.i.l.bf16 %v2889_v56 }
 0xa71   :  { %v2952_v31 = vpop.eup %2951  ;;  %v1142_v63 = vsel %vm240_vm8, %v3197_v27, %v2891_v58  ;;  %v1141_v0 = vsel %vm240_vm8, %v3195_v23, %v2890_v59  ;;  %v2471_v23 = vld [vmem:[%s3571_s6] ss:$0 sm:$0xff] }
 0xa72   :  { %v1009_v9 = vsel %vm240_vm8, %v2952_v31, 0.0  ;;  %v2894_v57 = vpop.permute.xlu1 %2893 }
 0xa73   :  { %1010 = vadd.xlane.f32.xlu0 %v1009_v9  ;;  %v2896_v60 = vunpack.i.h.bf16 %v2894_v57  ;;  %v2895_v61 = vunpack.i.l.bf16 %v2894_v57 }
 0xa75   :  { %v2954_v14 = vpop.eup %2953  ;;  %v1145_v3 = vsel %vm1143_vm10, %v1142_v63, %v2896_v60  ;;  %v1144_v4 = vsel %vm1143_vm10, %v1141_v0, %v2895_v61 }
 0xa76   :  { %v1012_v15 = vsel %vm240_vm8, %v2954_v14, 0.0 }
 0xa77   :  { %1013 = vadd.xlane.f32.xlu0 %v1012_v15 }
 0xa8d   :  { %1069 = vrot.lane.b32.xlu0 %v3141_v43, %s3012_s13 }
 0xb00   :  { %v1011_v34 = vpop.xlane.xlu0 %1010 }
 0xb01   :  { %2955 = vrcp.f32 %v1011_v34 }
 0xb04   :  { %v1014_v35 = vpop.xlane.xlu0 %1013 }
 0xb05   :  { %2957 = vrcp.f32 %v1014_v35 }
 0xb08   :  { %v1070_v36 = vpop.permute.xlu0 %1069 }
 0xb09   :  { %v1075_v37 = vsel %vm365_vm9, %v1070_v36, 0 }
 0xb0a   :  { %2723 = vmatpush3.bf16.msra.mxu0 %v1075_v37 }
 0xb0b   :  { %v2956_v38 = vpop.eup %2955  ;;  %2736 = vmatprep.subr.bf16.mxu0 %v3000_v10 }
 0xb0c   :  { %v1016_v39 = vmul.f32 %v2956_v38, %v2952_v31 }
 0xb0e   :  { %v1019_v41 = vpack.c.bf16 %v1016_v39, %v1016_v39 }
 0xb0f   :  { %v2958_v42 = vpop.eup %2957 }
 0xb10   :  { %v1018_v44 = vmul.f32 %v2958_v42, %v2954_v14  ;;  %2719 = vmatmul.mubr.msk.bf16.vlgmr.msra.gmra.mrb[32].mxu1 %vm240_vm8, %v1019_v41  ;;  %v2475_v42 = vld [vmem:[%s3572_s7] ss:$0 sm:$0xff] }
 0xb11   :  { %2732 = vmatprep.mubr.msk.bf16.mxu1 %vm3001_vm6, %v3000_v10  ;;  %2729 = vmatpush3.bf16.msra.mxu1 %v2919_v45 }
 0xb12   :  { %v1020_v43 = vpack.c.bf16 %v1018_v44, %v1018_v44  ;;  %2730 = vmatprep.subr.bf16.mxu1 %v3000_v10 }
 0xb14   :  { %2725 = vmatmul.mubr.msk.bf16.vlgmr.msra.gmra.mrb[32].mxu0 %vm240_vm8, %v1020_v43 }
 0xb15   :  { %2740 = vmatprep.mubr.msk.bf16.mxu0 %vm3001_vm6, %v3000_v10  ;;  %2731 = vmatpush3.bf16.msra.mxu1 %v2920_v46 }
 0xb16   :  { %2744 = vmatprep.subr.bf16.mxu1 %v3000_v10 }
 0xbe3   :  { %v1063_v47 = vpop.f32.mrb[32].mxu1 }
 0xbe4   :  { %v2720_v48 = vpop.f32.mrb[33].mxu1 }
 0xbe5   :  { %v1066_v49 = vpop.f32.mrb[34].mxu1  ;;  %v2476_v48 = vld [vmem:[%s3573_s8] ss:$0 sm:$0xff] }
 0xbe6   :  { %v2721_v50 = vpop.f32.mrb[35].mxu1 }
 0xbe7   :  { %v1111_v51 = vpop.f32.mrb[32].mxu0 }
 0xbe8   :  { %v2897_v52 = vpack.i.bf16 %v1111_v51, %v1063_v47  ;;  %v2726_v53 = vpop.f32.mrb[33].mxu0 }
 0xbe9   :  { %v1114_v54 = vpop.f32.mrb[34].mxu0  ;;  %v2482_v53 = vld [vmem:[%s3569_s4 + $0x1] ss:$0 sm:$0xff] }
 0xbea   :  { %v2727_v55 = vpop.f32.mrb[35].mxu0  ;;  %2898 = vrot.lane.b32.xlu0 %v2897_v52, %s3015_s19 }
 0xc5c   :  { %v2899_v62 = vpop.permute.xlu0 %2898 }
 0xc5d   :  { %v2901_v1 = vunpack.i.h.bf16 %v2899_v62  ;;  %v2900_v2 = vunpack.i.l.bf16 %v2899_v62 }
 0xc5f   :  { %v1148_v5 = vsel %vm1146_vm11, %v1145_v3, %v2901_v1  ;;  %v1147_v6 = vsel %vm1146_vm11, %v1144_v4, %v2900_v2 }
 0xc60   :  { %v1149_v7 = vpack.c.bf16 %v1148_v5, %v1147_v6 }
 0xc62   :  { %2733 = vmatmul.mubr.msk.bf16.vlgmr.msra.gmra.mrb[36].mxu1 %vm190_vm7, %v1149_v7 }
 0xc63   :  { %2746 = vmatprep.mubr.msk.bf16.mxu1 %vm3001_vm6, %v3000_v10 }
 0xd35   :  { %v1210_v27 = vpop.f32.mrb[36].mxu1 }
 0xd36   :  { %v1211_v8 = vadd.f32 %v2471_v23, %v1210_v27  ;;  %v2734_v11 = vpop.f32.mrb[37].mxu1 }
 0xd37   :  { %v1213_v12 = vpop.f32.mrb[38].mxu1 }
 0xd38   :  { %v1217_v13 = vadd.f32 %v1211_v8, %v3129_v33  ;;  %v1214_v16 = vadd.f32 %v2471_v23, %v1213_v12  ;;  %v2735_v17 = vpop.f32.mrb[39].mxu1  ;;  %v2921_v33 = vld [vmem:[%s3568_s3 + $0x10] sm:$0xff]  }
 0xd39   :  { %2737 = vmatpush3.bf16.msra.mxu0 %v2921_v33 }
 0xd3a   :  { %v1218_v18 = vadd.f32 %v3127_v32, %v1214_v16  ;;  %v1219_v19 = vsel %vm190_vm7, %v1217_v13, 0.0  ;;  %v1228_v22 = vmul.f32 %v1217_v13, %v1217_v13  ;;  %v2922_v32 = vld [vmem:[%s3568_s3 + $0x18] sm:$0xff]   ;;  %2738 = vmatprep.subr.bf16.mxu0 %v3000_v10 }
 0xd3b   :  { %1220 = vadd.xlane.f32.xlu1 %v1219_v19 }
 0xd3c   :  { %v1222_v20 = vsel %vm190_vm7, %v1218_v18, 0.0  ;;  %v1229_v21 = vmul.f32 %v1218_v18, %v1218_v18  ;;  %v1230_v25 = vsel %vm190_vm7, %v1228_v22, 0.0 }
 0xd3d   :  { %1223 = vadd.xlane.f32.xlu0 %v1222_v20  ;;  %2739 = vmatpush3.bf16.msra.mxu0 %v2922_v32 }
 0xd3e   :  { %v1233_v24 = vsel %vm190_vm7, %v1229_v21, 0.0  ;;  %2750 = vmatprep.subr.bf16.mxu0 %v3000_v10 }
 0xd3f   :  { %1234 = vadd.xlane.f32.xlu1 %v1233_v24 }
 0xd41   :  { %1231 = vadd.xlane.f32.xlu0 %v1230_v25 }
 0xdc8   :  { %v1221_v26 = vpop.xlane.xlu1 %1220 }
 0xdc9   :  { %v1226_v29 = vmul.f32 0.03125, %v1221_v26 }
 0xdca   :  { %v1224_v28 = vpop.xlane.xlu0 %1223 }
 0xdcb   :  { %v1227_v30 = vmul.f32 0.03125, %v1224_v28  ;;  %v1238_v15 = vmul.f32 %v1226_v29, %v1226_v29  ;;  %v1242_v44 = vsub.f32 %v1217_v13, %v1226_v29 }
 0xdcc   :  { %v1235_v40 = vpop.xlane.xlu1 %1234 }
 0xdcd   :  { %v1239_v31 = vmul.f32 %v1227_v30, %v1227_v30  ;;  %v1237_v9 = vmul.f32 0.03125, %v1235_v40  ;;  %v1243_v39 = vsub.f32 %v1218_v18, %v1227_v30 }
 0xdce   :  { %v1232_v14 = vpop.xlane.xlu0 %1231 }
 0xdcf   :  { %v1241_v34 = vsub.f32 %v1237_v9, %v1239_v31  ;;  %v1236_v35 = vmul.f32 0.03125, %v1232_v14 }
 0xdd1   :  { %v1245_v36 = vadd.f32 1e-12, %v1241_v34  ;;  %v1240_v37 = vsub.f32 %v1236_v35, %v1238_v15 }
 0xdd3   :  { %2959 = vrsqrt.f32 %v1245_v36  ;;  %v1244_v38 = vadd.f32 1e-12, %v1240_v37 }
 0xdd5   :  { %2961 = vrsqrt.f32 %v1244_v38 }
 0xddd   :  { %v2960_v41 = vpop.eup %2959 }
 0xdde   :  { %v1249_v43 = vmul.f32 %v2960_v41, %v1243_v39 }
 0xddf   :  { %v2962_v45 = vpop.eup %2961 }
 0xde0   :  { %v1248_v46 = vmul.f32 %v2962_v45, %v1242_v44  ;;  %v1258_v47 = vmul.f32 %v2475_v42, %v1249_v43 }
 0xde2   :  { %v1257_v49 = vmul.f32 %v2475_v42, %v1248_v46  ;;  %v3345_v51 = vadd.f32 %v2476_v48, %v1258_v47 }
 0xde4   :  { %v3343_v50 = vadd.f32 %v2476_v48, %v1257_v49 }
 0xde6   :  { %v1268_v52 = vpack.c.bf16 %v3345_v51, %v3343_v50 }
 0xde8   :  { %2741 = vmatmul.mubr.msk.bf16.vlgmr.msra.gmra.mrb[36].mxu0 %vm190_vm7, %v1268_v52 }
 0xde9   :  { %2752 = vmatprep.mubr.msk.bf16.mxu0 %vm3001_vm6, %v3000_v10 }
 0xebb   :  { %v1331_v54 = vpop.f32.mrb[36].mxu0 }
 0xebc   :  { %v1332_v55 = vadd.f32 %v2482_v53, %v1331_v54  ;;  %v2742_v56 = vpop.f32.mrb[37].mxu0 }
 0xebd   :  { %v1334_v57 = vpop.f32.mrb[38].mxu0 }
 0xebe   :  { %v3355_v58 = vpack.c.bf16 %v1332_v55, %v1332_v55  ;;  %v1335_v59 = vadd.f32 %v2482_v53, %v1334_v57  ;;  %v2743_v60 = vpop.f32.mrb[39].mxu0 }
 0xec0   :  { %v3357_v61 = vpack.c.bf16 %v1335_v59, %v1335_v59  ;;  %1341 = vrot.lane.b32.xlu0 %v3355_v58, %s3002_s23 }
 0xec2   :  { %1390 = vrot.lane.b32.xlu1 %v3357_v61, %s3002_s23 }
 0xf32   :  { %v1342_v62 = vpop.permute.xlu0 %1341 }
 0xf33   :  { %v1347_v63 = vsel %vm240_vm8, %v1342_v62, 0 }
 0xf34   :  { %2745 = vmatpush3.bf16.xpose.msra.mxu1 %v1347_v63  ;;  %v1391_v0 = vpop.permute.xlu1 %1390 }
 0xf35   :  { %v1396_v1 = vsel %vm240_vm8, %v1391_v0, 0  ;;  %2756 = vmatprep.subr.bf16.mxu1 %v3000_v10 }
 0xf36   :  { %2751 = vmatpush3.bf16.xpose.msra.mxu0 %v1396_v1 }
 0xf37   :  { %2762 = vmatprep.subr.bf16.mxu0 %v3000_v10 }
 0xf3b   :  { %2747 = vmatmul.mubr.msk.bf16.vlgmr.msra.gmra.mrb[40].mxu1 %vm240_vm8, %v3355_v58 }
 0xf3c   :  { %2758 = vmatprep.mubr.msk.bf16.mxu1 %vm3001_vm6, %v3000_v10 }
 0xf3d   :  { %2753 = vmatmul.mubr.msk.bf16.vlgmr.msra.gmra.mrb[40].mxu0 %vm240_vm8, %v3357_v61 }
 0xf3e   :  { %2764 = vmatprep.mubr.msk.bf16.mxu0 %vm3001_vm6, %v3000_v10 }
0x100e   :  { %v1383_v2 = vpop.f32.mrb[40].mxu1 }
0x100f   :  { %v2748_v3 = vpop.f32.mrb[41].mxu1  ;;  %v1438_v4 = vsel %vm240_vm8, %v1383_v2, -inf }
0x1010   :  { %v1432_v5 = vpop.f32.mrb[40].mxu0  ;;  %1439 = vmax.xlane.f32.xlu1 %v1438_v4  ;;  %v1386_v6 = vpop.f32.mrb[42].mxu1 }
0x1011   :  { %v2749_v7 = vpop.f32.mrb[43].mxu1  ;;  %v2754_v23 = vpop.f32.mrb[41].mxu0  ;;  %v1441_v27 = vsel %vm240_vm8, %v1432_v5, -inf }
0x1012   :  { %1442 = vmax.xlane.f32.xlu0 %v1441_v27  ;;  %v1435_v8 = vpop.f32.mrb[42].mxu0 }
0x1013   :  { %v2755_v11 = vpop.f32.mrb[43].mxu0 }
0x1021   :  { %1510 = vrot.lane.b32.xlu1 %v3357_v61, %s3003_s24 }
0x1028   :  { %1462 = vrot.lane.b32.xlu0 %v3355_v58, %s3003_s24 }
0x109d   :  { %v1440_v12 = vpop.xlane.xlu1 %1439 }
0x109e   :  { %v1444_v13 = vsub.f32 %v1383_v2, %v1440_v12 }
0x109f   :  { %v1443_v16 = vpop.xlane.xlu0 %1442 }
0x10a0   :  { %v1446_v17 = vmul.f32 1.442695, %v1444_v13  ;;  %v1445_v18 = vsub.f32 %v1432_v5, %v1443_v16 }
0x10a1   :  { %v1511_v19 = vpop.permute.xlu1 %1510 }
0x10a2   :  { %2963 = vpow2.f32 %v1446_v17  ;;  %v1448_v20 = vmul.f32 1.442695, %v1445_v18  ;;  %v1516_v21 = vsel %vm365_vm9, %v1511_v19, 0 }
0x10a3   :  { %v1463_v22 = vpop.permute.xlu0 %1462  ;;  %2763 = vmatpush3.bf16.msra.mxu0 %v1516_v21 }
0x10a4   :  { %2965 = vpow2.f32 %v1448_v20  ;;  %v1468_v24 = vsel %vm365_vm9, %v1463_v22, 0  ;;  %2774 = vmatprep.subr.bf16.mxu0 %v3000_v10 }
0x10a5   :  { %2757 = vmatpush3.bf16.msra.mxu1 %v1468_v24 }
0x10a6   :  { %2768 = vmatprep.subr.bf16.mxu1 %v3000_v10 }
0x10ac   :  { %v2964_v25 = vpop.eup %2963 }
0x10ad   :  { %v1450_v33 = vsel %vm240_vm8, %v2964_v25, 0.0 }
0x10ae   :  { %v2966_v32 = vpop.eup %2965  ;;  %1451 = vadd.xlane.f32.xlu0 %v1450_v33 }
0x10af   :  { %v1453_v26 = vsel %vm240_vm8, %v2966_v32, 0.0 }
0x10b0   :  { %1454 = vadd.xlane.f32.xlu1 %v1453_v26 }
0x10c1   :  { %1560 = vrot.lane.b32.xlu1 %v3355_v58, %s3004_s25 }
0x10c4   :  { %1610 = vrot.lane.b32.xlu0 %v3357_v61, %s3004_s25 }
0x10c5   :  { %1558 = vrot.lane.b32.xlu1 %v3355_v58, %s3005_s26 }
0x10c8   :  { %1608 = vrot.lane.b32.xlu0 %v3357_v61, %s3005_s26 }
0x113b   :  { %v1452_v28 = vpop.xlane.xlu0 %1451 }
0x113c   :  { %2967 = vrcp.f32 %v1452_v28 }
0x113d   :  { %v1455_v29 = vpop.xlane.xlu1 %1454 }
0x113e   :  { %2969 = vrcp.f32 %v1455_v29 }
0x113f   :  { %v1611_v34 = vpop.permute.xlu0 %1610 }
0x1140   :  { %v1616_v37 = vsel %vm240_vm8, %v1611_v34, 0 }
0x1141   :  { %v1561_v9 = vpop.permute.xlu1 %1560 }
0x1142   :  { %v1566_v35 = vsel %vm240_vm8, %v1561_v9, 0 }
0x1143   :  { %v1609_v39 = vpop.permute.xlu0 %1608 }
0x1145   :  { %v1559_v38 = vpop.permute.xlu1 %1558 }
0x1146   :  { %v2968_v30 = vpop.eup %2967 }
0x1147   :  { %v1457_v40 = vmul.f32 %v2968_v30, %v2964_v25 }
0x1148   :  { %v2970_v31 = vpop.eup %2969 }
0x1149   :  { %v1459_v14 = vmul.f32 %v2970_v31, %v2966_v32  ;;  %v1460_v15 = vpack.c.bf16 %v1457_v40, %v1457_v40 }
0x114b   :  { %2759 = vmatmul.mubr.msk.bf16.vlgmr.msra.gmra.mrb[44].mxu1 %vm240_vm8, %v1460_v15  ;;  %v1461_v36 = vpack.c.bf16 %v1459_v14, %v1459_v14 }
0x114c   :  { %2769 = vmatpush3.bf16.xpose.msra.mxu1 %v1566_v35  ;;  %2770 = vmatprep.mubr.msk.bf16.mxu1 %vm3001_vm6, %v3000_v10 }
0x114d   :  { %2765 = vmatmul.mubr.msk.bf16.vlgmr.msra.gmra.mrb[44].mxu0 %vm240_vm8, %v1461_v36  ;;  %2780 = vmatprep.subr.bf16.mxu1 %v3000_v10 }
0x114e   :  { %2775 = vmatpush3.bf16.xpose.msra.mxu0 %v1616_v37  ;;  %2776 = vmatprep.mubr.msk.bf16.mxu0 %vm3001_vm6, %v3000_v10 }
0x114f   :  { %2786 = vmatprep.subr.bf16.mxu0 %v3000_v10 }
0x1153   :  { %2771 = vmatmul.mubr.msk.bf16.vlgmr.msra.gmra.mrb[48].mxu1 %vm240_vm8, %v1559_v38 }
0x1154   :  { %2782 = vmatprep.mubr.msk.bf16.mxu1 %vm3001_vm6, %v3000_v10 }
0x1155   :  { %2777 = vmatmul.mubr.msk.bf16.vlgmr.msra.gmra.mrb[48].mxu0 %vm240_vm8, %v1609_v39 }
0x1156   :  { %2788 = vmatprep.mubr.msk.bf16.mxu0 %vm3001_vm6, %v3000_v10 }
0x121e   :  { %v3411_v41 = vpop.f32.mrb[44].mxu1 }
0x121f   :  { %v2760_v42 = vpop.f32.mrb[45].mxu1 }
0x1220   :  { %v1507_v44 = vpop.f32.mrb[46].mxu1  ;;  %v3413_v43 = vpop.f32.mrb[44].mxu0 }
0x1221   :  { %v2761_v45 = vpop.f32.mrb[47].mxu1  ;;  %v2766_v46 = vpop.f32.mrb[45].mxu0 }
0x1222   :  { %v1555_v47 = vpop.f32.mrb[46].mxu0 }
0x1223   :  { %v2767_v48 = vpop.f32.mrb[47].mxu0 }
0x1226   :  { %v1602_v49 = vpop.f32.mrb[48].mxu1 }
0x1227   :  { %v2772_v52 = vpop.f32.mrb[49].mxu1  ;;  %v1658_v53 = vsel %vm240_vm8, %v1602_v49, -inf }
0x1228   :  { %v1652_v54 = vpop.f32.mrb[48].mxu0  ;;  %1659 = vmax.xlane.f32.xlu1 %v1658_v53  ;;  %v1605_v55 = vpop.f32.mrb[50].mxu1 }
0x1229   :  { %v2773_v56 = vpop.f32.mrb[51].mxu1  ;;  %v2778_v57 = vpop.f32.mrb[49].mxu0  ;;  %v1661_v59 = vsel %vm240_vm8, %v1652_v54, -inf }
0x122a   :  { %1662 = vmax.xlane.f32.xlu0 %v1661_v59  ;;  %v1655_v60 = vpop.f32.mrb[50].mxu0 }
0x122b   :  { %v2779_v62 = vpop.f32.mrb[51].mxu0 }
0x1239   :  { %1730 = vrot.lane.b32.xlu1 %v3357_v61, %s3006_s27 }
0x1240   :  { %1682 = vrot.lane.b32.xlu0 %v3355_v58, %s3006_s27 }
0x12b5   :  { %v1660_v63 = vpop.xlane.xlu1 %1659 }
0x12b6   :  { %v1664_v0 = vsub.f32 %v1602_v49, %v1660_v63 }
0x12b7   :  { %v1663_v1 = vpop.xlane.xlu0 %1662 }
0x12b8   :  { %v1666_v2 = vmul.f32 1.442695, %v1664_v0  ;;  %v1665_v3 = vsub.f32 %v1652_v54, %v1663_v1 }
0x12b9   :  { %v1731_v4 = vpop.permute.xlu1 %1730 }
0x12ba   :  { %2971 = vpow2.f32 %v1666_v2  ;;  %v1668_v5 = vmul.f32 1.442695, %v1665_v3  ;;  %v1736_v6 = vsel %vm365_vm9, %v1731_v4, 0 }
0x12bb   :  { %v1683_v7 = vpop.permute.xlu0 %1682  ;;  %2787 = vmatpush3.bf16.msra.mxu0 %v1736_v6 }
0x12bc   :  { %2973 = vpow2.f32 %v1668_v5  ;;  %v1688_v23 = vsel %vm365_vm9, %v1683_v7, 0  ;;  %2798 = vmatprep.subr.bf16.mxu0 %v3000_v10 }
0x12bd   :  { %2781 = vmatpush3.bf16.msra.mxu1 %v1688_v23 }
0x12be   :  { %2792 = vmatprep.subr.bf16.mxu1 %v3000_v10 }
0x12c4   :  { %v2972_v27 = vpop.eup %2971 }
0x12c5   :  { %v1670_v8 = vsel %vm240_vm8, %v2972_v27, 0.0 }
0x12c6   :  { %v2974_v11 = vpop.eup %2973  ;;  %1671 = vadd.xlane.f32.xlu0 %v1670_v8 }
0x12c7   :  { %v1673_v12 = vsel %vm240_vm8, %v2974_v11, 0.0 }
0x12c8   :  { %1674 = vadd.xlane.f32.xlu1 %v1673_v12 }
0x12d9   :  { %1780 = vrot.lane.b32.xlu1 %v3355_v58, %s3007_s28 }
0x12dc   :  { %1830 = vrot.lane.b32.xlu0 %v3357_v61, %s3007_s28 }
0x12dd   :  { %1778 = vrot.lane.b32.xlu1 %v3355_v58, %s3008_s0 }
0x12e0   :  { %1828 = vrot.lane.b32.xlu0 %v3357_v61, %s3008_s0 }
0x1353   :  { %v1672_v13 = vpop.xlane.xlu0 %1671 }
0x1354   :  { %2975 = vrcp.f32 %v1672_v13 }
0x1355   :  { %v1675_v16 = vpop.xlane.xlu1 %1674 }
0x1356   :  { %2977 = vrcp.f32 %v1675_v16 }
0x1357   :  { %v1831_v24 = vpop.permute.xlu0 %1830 }
0x1358   :  { %v1836_v32 = vsel %vm240_vm8, %v1831_v24, 0 }
0x1359   :  { %v1781_v20 = vpop.permute.xlu1 %1780 }
0x135a   :  { %v1786_v25 = vsel %vm240_vm8, %v1781_v20, 0 }
0x135b   :  { %v1829_v28 = vpop.permute.xlu0 %1828 }
0x135d   :  { %v1779_v26 = vpop.permute.xlu1 %1778 }
0x135e   :  { %v2976_v17 = vpop.eup %2975 }
0x135f   :  { %v1677_v18 = vmul.f32 %v2976_v17, %v2972_v27 }
0x1360   :  { %v2978_v19 = vpop.eup %2977 }
0x1361   :  { %v1679_v21 = vmul.f32 %v2978_v19, %v2974_v11  ;;  %v1680_v22 = vpack.c.bf16 %v1677_v18, %v1677_v18 }
0x1363   :  { %2783 = vmatmul.mubr.msk.bf16.vlgmr.msra.gmra.mrb[52].mxu1 %vm240_vm8, %v1680_v22  ;;  %v1681_v33 = vpack.c.bf16 %v1679_v21, %v1679_v21 }
0x1364   :  { %2793 = vmatpush3.bf16.xpose.msra.mxu1 %v1786_v25  ;;  %2794 = vmatprep.mubr.msk.bf16.mxu1 %vm3001_vm6, %v3000_v10 }
0x1365   :  { %2789 = vmatmul.mubr.msk.bf16.vlgmr.msra.gmra.mrb[52].mxu0 %vm240_vm8, %v1681_v33  ;;  %2804 = vmatprep.subr.bf16.mxu1 %v3000_v10 }
0x1366   :  { %2799 = vmatpush3.bf16.xpose.msra.mxu0 %v1836_v32  ;;  %2800 = vmatprep.mubr.msk.bf16.mxu0 %vm3001_vm6, %v3000_v10 }
0x1367   :  { %2810 = vmatprep.subr.bf16.mxu0 %v3000_v10 }
0x136b   :  { %2795 = vmatmul.mubr.msk.bf16.vlgmr.msra.gmra.mrb[56].mxu1 %vm240_vm8, %v1779_v26 }
0x136c   :  { %2806 = vmatprep.mubr.msk.bf16.mxu1 %vm3001_vm6, %v3000_v10 }
0x136d   :  { %2801 = vmatmul.mubr.msk.bf16.vlgmr.msra.gmra.mrb[56].mxu0 %vm240_vm8, %v1829_v28 }
0x136e   :  { %2812 = vmatprep.mubr.msk.bf16.mxu0 %vm3001_vm6, %v3000_v10 }
0x1436   :  { %v3451_v29 = vpop.f32.mrb[52].mxu1 }
0x1437   :  { %v2784_v30 = vpop.f32.mrb[53].mxu1 }
0x1438   :  { %v1727_v40 = vpop.f32.mrb[54].mxu1  ;;  %v3453_v31 = vpop.f32.mrb[52].mxu0 }
0x1439   :  { %v2902_v9 = vpack.i.bf16 %v3453_v31, %v3451_v29  ;;  %v2785_v14 = vpop.f32.mrb[55].mxu1  ;;  %v2790_v15 = vpop.f32.mrb[53].mxu0 }
0x143a   :  { %v1775_v34 = vpop.f32.mrb[54].mxu0 }
0x143b   :  { %v2791_v35 = vpop.f32.mrb[55].mxu0 }
0x143e   :  { %v1822_v36 = vpop.f32.mrb[56].mxu1 }
0x143f   :  { %v2796_v37 = vpop.f32.mrb[57].mxu1  ;;  %v1878_v38 = vsel %vm240_vm8, %v1822_v36, -inf }
0x1440   :  { %v1872_v39 = vpop.f32.mrb[56].mxu0  ;;  %1879 = vmax.xlane.f32.xlu1 %v1878_v38  ;;  %v1825_v42 = vpop.f32.mrb[58].mxu1 }
0x1441   :  { %v2797_v44 = vpop.f32.mrb[59].mxu1  ;;  %v2802_v45 = vpop.f32.mrb[57].mxu0  ;;  %v1881_v46 = vsel %vm240_vm8, %v1872_v39, -inf }
0x1442   :  { %1882 = vmax.xlane.f32.xlu0 %v1881_v46  ;;  %v1875_v47 = vpop.f32.mrb[58].mxu0 }
0x1443   :  { %v2803_v48 = vpop.f32.mrb[59].mxu0 }
0x1451   :  { %1950 = vrot.lane.b32.xlu1 %v3357_v61, %s3009_s29 }
0x1458   :  { %1902 = vrot.lane.b32.xlu0 %v3355_v58, %s3009_s29 }
0x14cd   :  { %v1880_v49 = vpop.xlane.xlu1 %1879 }
0x14ce   :  { %v1884_v52 = vsub.f32 %v1822_v36, %v1880_v49 }
0x14cf   :  { %v1883_v53 = vpop.xlane.xlu0 %1882 }
0x14d0   :  { %v1886_v54 = vmul.f32 1.442695, %v1884_v52  ;;  %v1885_v55 = vsub.f32 %v1872_v39, %v1883_v53 }
0x14d1   :  { %v1951_v56 = vpop.permute.xlu1 %1950 }
0x14d2   :  { %2979 = vpow2.f32 %v1886_v54  ;;  %v1888_v57 = vmul.f32 1.442695, %v1885_v55  ;;  %v1956_v59 = vsel %vm365_vm9, %v1951_v56, 0 }
0x14d3   :  { %v1903_v60 = vpop.permute.xlu0 %1902  ;;  %2811 = vmatpush3.bf16.msra.mxu0 %v1956_v59 }
0x14d4   :  { %2981 = vpow2.f32 %v1888_v57  ;;  %v1908_v62 = vsel %vm365_vm9, %v1903_v60, 0  ;;  %2822 = vmatprep.subr.bf16.mxu0 %v3000_v10 }
0x14d5   :  { %2805 = vmatpush3.bf16.msra.mxu1 %v1908_v62 }
0x14d6   :  { %2816 = vmatprep.subr.bf16.mxu1 %v3000_v10 }
0x14dc   :  { %v2980_v63 = vpop.eup %2979 }
0x14dd   :  { %v1890_v0 = vsel %vm240_vm8, %v2980_v63, 0.0 }
0x14de   :  { %v2982_v1 = vpop.eup %2981  ;;  %1891 = vadd.xlane.f32.xlu0 %v1890_v0  ;;  %v2924_v0 = vld [vmem:[%s3570_s5 + $0x18] sm:$0xff]  }
0x14df   :  { %v1893_v2 = vsel %vm240_vm8, %v2982_v1, 0.0 }
0x14e0   :  { %1894 = vadd.xlane.f32.xlu1 %v1893_v2 }
0x14f1   :  { %2000 = vrot.lane.b32.xlu1 %v3355_v58, %s3010_s30 }
0x14f4   :  { %2050 = vrot.lane.b32.xlu0 %v3357_v61, %s3010_s30 }
0x14f5   :  { %1998 = vrot.lane.b32.xlu1 %v3355_v58, %s3011_s12 }
0x14f8   :  { %2048 = vrot.lane.b32.xlu0 %v3357_v61, %s3011_s12 }
0x156b   :  { %v1892_v3 = vpop.xlane.xlu0 %1891 }
0x156c   :  { %2983 = vrcp.f32 %v1892_v3 }
0x156d   :  { %v1895_v4 = vpop.xlane.xlu1 %1894 }
0x156e   :  { %2985 = vrcp.f32 %v1895_v4 }
0x156f   :  { %v2051_v11 = vpop.permute.xlu0 %2050 }
0x1570   :  { %v2056_v16 = vsel %vm240_vm8, %v2051_v11, 0 }
0x1571   :  { %v2001_v23 = vpop.permute.xlu1 %2000 }
0x1572   :  { %v2006_v12 = vsel %vm240_vm8, %v2001_v23, 0 }
0x1573   :  { %v2049_v18 = vpop.permute.xlu0 %2048 }
0x1575   :  { %v1999_v17 = vpop.permute.xlu1 %1998 }
0x1576   :  { %v2984_v5 = vpop.eup %2983 }
0x1577   :  { %v1897_v6 = vmul.f32 %v2984_v5, %v2980_v63  ;;  %v2923_v63 = vld [vmem:[%s3570_s5 + $0x10] sm:$0xff]  }
0x1578   :  { %v2986_v7 = vpop.eup %2985 }
0x1579   :  { %v1899_v27 = vmul.f32 %v2986_v7, %v2982_v1  ;;  %v1900_v8 = vpack.c.bf16 %v1897_v6, %v1897_v6 }
0x157b   :  { %2807 = vmatmul.mubr.msk.bf16.vlgmr.msra.gmra.mrb[60].mxu1 %vm240_vm8, %v1900_v8  ;;  %v1901_v13 = vpack.c.bf16 %v1899_v27, %v1899_v27 }
0x157c   :  { %2817 = vmatpush3.bf16.xpose.msra.mxu1 %v2006_v12  ;;  %2818 = vmatprep.mubr.msk.bf16.mxu1 %vm3001_vm6, %v3000_v10 }
0x157d   :  { %2813 = vmatmul.mubr.msk.bf16.vlgmr.msra.gmra.mrb[60].mxu0 %vm240_vm8, %v1901_v13  ;;  %2828 = vmatprep.subr.bf16.mxu1 %v3000_v10 }
0x157e   :  { %2823 = vmatpush3.bf16.xpose.msra.mxu0 %v2056_v16  ;;  %2824 = vmatprep.mubr.msk.bf16.mxu0 %vm3001_vm6, %v3000_v10 }
0x157f   :  { %2834 = vmatprep.subr.bf16.mxu0 %v3000_v10 }
0x1583   :  { %2819 = vmatmul.mubr.msk.bf16.vlgmr.msra.gmra.mrb[64].mxu1 %vm240_vm8, %v1999_v17 }
0x1584   :  { %2830 = vmatprep.mubr.msk.bf16.mxu1 %vm3001_vm6, %v3000_v10 }
0x1585   :  { %2825 = vmatmul.mubr.msk.bf16.vlgmr.msra.gmra.mrb[64].mxu0 %vm240_vm8, %v2049_v18 }
0x1586   :  { %2836 = vmatprep.mubr.msk.bf16.mxu0 %vm3001_vm6, %v3000_v10 }
0x164e   :  { %v1944_v19 = vpop.f32.mrb[60].mxu1 }
0x164f   :  { %v2808_v20 = vpop.f32.mrb[61].mxu1 }
0x1650   :  { %v1947_v21 = vpop.f32.mrb[62].mxu1  ;;  %v1992_v22 = vpop.f32.mrb[60].mxu0 }
0x1651   :  { %v2907_v24 = vpack.i.bf16 %v1992_v22, %v1944_v19  ;;  %v2809_v25 = vpop.f32.mrb[63].mxu1  ;;  %v2814_v33 = vpop.f32.mrb[61].mxu0 }
0x1652   :  { %v1995_v32 = vpop.f32.mrb[62].mxu0 }
0x1653   :  { %v2815_v26 = vpop.f32.mrb[63].mxu0 }
0x1656   :  { %v2042_v28 = vpop.f32.mrb[64].mxu1 }
0x1657   :  { %v2820_v30 = vpop.f32.mrb[65].mxu1  ;;  %v2098_v40 = vsel %vm240_vm8, %v2042_v28, -inf }
0x1658   :  { %v2092_v14 = vpop.f32.mrb[64].mxu0  ;;  %2099 = vmax.xlane.f32.xlu1 %v2098_v40  ;;  %v2045_v15 = vpop.f32.mrb[66].mxu1 }
0x1659   :  { %v2821_v34 = vpop.f32.mrb[67].mxu1  ;;  %v2826_v35 = vpop.f32.mrb[65].mxu0  ;;  %v2101_v36 = vsel %vm240_vm8, %v2092_v14, -inf }
0x165a   :  { %2102 = vmax.xlane.f32.xlu0 %v2101_v36  ;;  %v2095_v37 = vpop.f32.mrb[66].mxu0 }
0x165b   :  { %v2827_v38 = vpop.f32.mrb[67].mxu0 }
0x16e5   :  { %v2100_v39 = vpop.xlane.xlu1 %2099 }
0x16e6   :  { %v2104_v42 = vsub.f32 %v2042_v28, %v2100_v39 }
0x16e7   :  { %v2103_v44 = vpop.xlane.xlu0 %2102 }
0x16e8   :  { %v2106_v45 = vmul.f32 1.442695, %v2104_v42  ;;  %v2105_v46 = vsub.f32 %v2092_v14, %v2103_v44 }
0x16ea   :  { %2987 = vpow2.f32 %v2106_v45  ;;  %v2108_v47 = vmul.f32 1.442695, %v2105_v46 }
0x16ec   :  { %2989 = vpow2.f32 %v2108_v47 }
0x16f4   :  { %v2988_v48 = vpop.eup %2987 }
0x16f5   :  { %v2110_v49 = vsel %vm240_vm8, %v2988_v48, 0.0 }
0x16f6   :  { %v2990_v52 = vpop.eup %2989  ;;  %2111 = vadd.xlane.f32.xlu0 %v2110_v49 }
0x16f7   :  { %v2113_v53 = vsel %vm240_vm8, %v2990_v52, 0.0 }
0x16f8   :  { %2114 = vadd.xlane.f32.xlu1 %v2113_v53 }
0x1709   :  { %2170 = vrot.lane.b32.xlu1 %v3357_v61, %s3012_s13 }
0x170c   :  { %2122 = vrot.lane.b32.xlu0 %v3355_v58, %s3012_s13 }
0x170d   :  { %2903 = vrot.lane.b32.xlu1 %v2902_v9, %s3013_s14 }
0x1710   :  { %2908 = vrot.lane.b32.xlu0 %v2907_v24, %s3014_s15 }
0x1783   :  { %v2112_v54 = vpop.xlane.xlu0 %2111 }
0x1784   :  { %2991 = vrcp.f32 %v2112_v54 }
0x1785   :  { %v2115_v55 = vpop.xlane.xlu1 %2114 }
0x1786   :  { %2993 = vrcp.f32 %v2115_v55 }
0x1787   :  { %v2123_v56 = vpop.permute.xlu0 %2122 }
0x1788   :  { %v2128_v57 = vsel %vm365_vm9, %v2123_v56, 0 }
0x1789   :  { %2829 = vmatpush3.bf16.msra.mxu1 %v2128_v57  ;;  %v2171_v59 = vpop.permute.xlu1 %2170 }
0x178a   :  { %v2176_v61 = vsel %vm365_vm9, %v2171_v59, 0  ;;  %2840 = vmatprep.subr.bf16.mxu1 %v3000_v10 }
0x178b   :  { %2835 = vmatpush3.bf16.msra.mxu0 %v2176_v61  ;;  %v2909_v13 = vpop.permute.xlu0 %2908 }
0x178c   :  { %2848 = vmatprep.subr.bf16.mxu0 %v3000_v10  ;;  %v2911_v18 = vunpack.i.h.bf16 %v2909_v13  ;;  %v2910_v19 = vunpack.i.l.bf16 %v2909_v13 }
0x178d   :  { %v2904_v8 = vpop.permute.xlu1 %2903 }
0x178e   :  { %v2992_v58 = vpop.eup %2991  ;;  %v2906_v11 = vunpack.i.h.bf16 %v2904_v8  ;;  %v2905_v12 = vunpack.i.l.bf16 %v2904_v8 }
0x178f   :  { %v2117_v29 = vmul.f32 %v2992_v58, %v2988_v48 }
0x1790   :  { %v2994_v31 = vpop.eup %2993  ;;  %v2243_v16 = vsel %vm240_vm8, %v3413_v43, %v2906_v11  ;;  %v2242_v17 = vsel %vm240_vm8, %v3411_v41, %v2905_v12  ;;  %v2507_v41 = vld [vmem:[%s3571_s6 + $0x1] ss:$0 sm:$0xff] }
0x1791   :  { %v2119_v9 = vmul.f32 %v2994_v31, %v2990_v52  ;;  %v2120_v60 = vpack.c.bf16 %v2117_v29, %v2117_v29  ;;  %v2244_v24 = vsel %vm1143_vm10, %v2242_v17, %v2910_v19  ;;  %v2245_v25 = vsel %vm1143_vm10, %v2243_v16, %v2911_v18 }
0x1793   :  { %2831 = vmatmul.mubr.msk.bf16.vlgmr.msra.gmra.mrb[68].mxu1 %vm240_vm8, %v2120_v60  ;;  %v2121_v62 = vpack.c.bf16 %v2119_v9, %v2119_v9  ;;  %v2512_v9 = vld [vmem:[%s3572_s7 + $0x1] ss:$0 sm:$0xff] }
0x1794   :  { %2844 = vmatprep.mubr.msk.bf16.mxu1 %vm3001_vm6, %v3000_v10  ;;  %2841 = vmatpush3.bf16.msra.mxu1 %v2923_v63 }
0x1795   :  { %2837 = vmatmul.mubr.msk.bf16.vlgmr.msra.gmra.mrb[68].mxu0 %vm240_vm8, %v2121_v62  ;;  %2842 = vmatprep.subr.bf16.mxu1 %v3000_v10 }
0x1796   :  { %2852 = vmatprep.mubr.msk.bf16.mxu0 %vm3001_vm6, %v3000_v10 }
0x1798   :  { %2843 = vmatpush3.bf16.msra.mxu1 %v2924_v0 }
0x1866   :  { %v2164_v1 = vpop.f32.mrb[68].mxu1 }
0x1867   :  { %v2832_v2 = vpop.f32.mrb[69].mxu1 }
0x1868   :  { %v2167_v3 = vpop.f32.mrb[70].mxu1  ;;  %v2212_v4 = vpop.f32.mrb[68].mxu0 }
0x1869   :  { %v2912_v5 = vpack.i.bf16 %v2212_v4, %v2164_v1  ;;  %v2833_v6 = vpop.f32.mrb[71].mxu1  ;;  %v2838_v7 = vpop.f32.mrb[69].mxu0  ;;  %v2514_v1 = vld [vmem:[%s3573_s8 + $0x1] ss:$0 sm:$0xff] }
0x186a   :  { %v2215_v23 = vpop.f32.mrb[70].mxu0  ;;  %v2515_v6 = vld [vmem:[%s3575_s10] ss:$0 sm:$0xff] }
0x186b   :  { %v2839_v27 = vpop.f32.mrb[71].mxu0  ;;  %2913 = vrot.lane.b32.xlu1 %v2912_v5, %s3015_s19 }
0x18dd   :  { %v2914_v20 = vpop.permute.xlu1 %2913 }
0x18de   :  { %v2916_v21 = vunpack.i.h.bf16 %v2914_v20  ;;  %v2915_v22 = vunpack.i.l.bf16 %v2914_v20 }
0x18e0   :  { %v2247_v33 = vsel %vm1146_vm11, %v2245_v25, %v2916_v21  ;;  %v2246_v32 = vsel %vm1146_vm11, %v2244_v24, %v2915_v22 }
0x18e1   :  { %v2248_v26 = vpack.c.bf16 %v2247_v33, %v2246_v32 }
0x18e3   :  { %2845 = vmatmul.mubr.msk.bf16.vlgmr.msra.gmra.mrb[72].mxu1 %vm190_vm7, %v2248_v26 }
0x19b6   :  { %v2311_v43 = vpop.f32.mrb[72].mxu1 }
0x19b7   :  { %v2312_v28 = vadd.f32 %v2507_v41, %v2311_v43  ;;  %v2846_v30 = vpop.f32.mrb[73].mxu1 }
0x19b8   :  { %v2314_v40 = vpop.f32.mrb[74].mxu1 }
0x19b9   :  { %v2318_v14 = vadd.f32 %v2312_v28, %v3343_v50  ;;  %v2315_v15 = vadd.f32 %v2507_v41, %v2314_v40  ;;  %v2847_v34 = vpop.f32.mrb[75].mxu1  ;;  %v2925_v50 = vld [vmem:[%s3574_s9] sm:$0xff]  }
0x19ba   :  { %2849 = vmatpush3.bf16.msra.mxu0 %v2925_v50 }
0x19bb   :  { %v2319_v35 = vadd.f32 %v2315_v15, %v3345_v51  ;;  %v2320_v36 = vsel %vm190_vm7, %v2318_v14, 0.0  ;;  %v2328_v37 = vmul.f32 %v2318_v14, %v2318_v14  ;;  %v2926_v51 = vld [vmem:[%s3574_s9 + $0x8] sm:$0xff]   ;;  %2850 = vmatprep.subr.bf16.mxu0 %v3000_v10 }
0x19bc   :  { %2321 = vadd.xlane.f32.xlu0 %v2320_v36 }
0x19bd   :  { %v2323_v38 = vsel %vm190_vm7, %v2319_v35, 0.0  ;;  %v2330_v39 = vsel %vm190_vm7, %v2328_v37, 0.0  ;;  %v2329_v42 = vmul.f32 %v2319_v35, %v2319_v35 }
0x19be   :  { %2324 = vadd.xlane.f32.xlu1 %v2323_v38  ;;  %2851 = vmatpush3.bf16.msra.mxu0 %v2926_v51 }
0x19bf   :  { %v2333_v44 = vsel %vm190_vm7, %v2329_v42, 0.0 }
0x19c0   :  { %2331 = vadd.xlane.f32.xlu0 %v2330_v39 }
0x19c4   :  { %2334 = vadd.xlane.f32.xlu0 %v2333_v44 }
0x1a49   :  { %v2322_v45 = vpop.xlane.xlu0 %2321 }
0x1a4a   :  { %v2326_v46 = vmul.f32 0.03125, %v2322_v45 }
0x1a4b   :  { %v2325_v47 = vpop.xlane.xlu1 %2324 }
0x1a4c   :  { %v2338_v49 = vmul.f32 %v2326_v46, %v2326_v46  ;;  %v2327_v52 = vmul.f32 0.03125, %v2325_v47  ;;  %v2342_v29 = vsub.f32 %v2318_v14, %v2326_v46 }
0x1a4d   :  { %v2332_v48 = vpop.xlane.xlu0 %2331 }
0x1a4e   :  { %v2336_v53 = vmul.f32 0.03125, %v2332_v48  ;;  %v2339_v56 = vmul.f32 %v2327_v52, %v2327_v52  ;;  %v2343_v60 = vsub.f32 %v2319_v35, %v2327_v52 }
0x1a50   :  { %v2340_v54 = vsub.f32 %v2336_v53, %v2338_v49 }
0x1a51   :  { %v2335_v55 = vpop.xlane.xlu0 %2334 }
0x1a52   :  { %v2344_v57 = vadd.f32 1e-12, %v2340_v54  ;;  %v2337_v59 = vmul.f32 0.03125, %v2335_v55 }
0x1a54   :  { %2995 = vrsqrt.f32 %v2344_v57  ;;  %v2341_v61 = vsub.f32 %v2337_v59, %v2339_v56 }
0x1a56   :  { %v2345_v58 = vadd.f32 1e-12, %v2341_v61 }
0x1a58   :  { %2997 = vrsqrt.f32 %v2345_v58 }
0x1a5e   :  { %v2996_v31 = vpop.eup %2995 }
0x1a5f   :  { %v2348_v10 = vmul.f32 %v2996_v31, %v2342_v29 }
0x1a61   :  { %v2358_v0 = vmul.f32 %v2512_v9, %v2348_v10 }
0x1a62   :  { %v2998_v62 = vpop.eup %2997 }
0x1a63   :  { %v2349_v63 = vmul.f32 %v2998_v62, %v2343_v60  ;;  %v2368_v3 = vadd.f32 %v2514_v1, %v2358_v0 }
0x1a65   :  { %v2359_v2 = vmul.f32 %v2512_v9, %v2349_v63 }
0x1a67   :  { %v2369_v4 = vadd.f32 %v2514_v1, %v2359_v2 }
0x1a69   :  { %v2370_v5 = vpack.c.bf16 %v2369_v4, %v2368_v3 }
0x1a6b   :  { %2853 = vmatmul.mubr.msk.bf16.vlgmr.msra.gmra.mrb[72].mxu0 %vm190_vm7, %v2370_v5 }
0x1b3e   :  { %v2431_v7 = vpop.f32.mrb[72].mxu0 }
0x1b3f   :  { %v2432_v23 = vadd.f32 %v2515_v6, %v2431_v7  ;;  %v2854_v27 = vpop.f32.mrb[73].mxu0 }
0x1b40   :  { %v2434_v8 = vpop.f32.mrb[74].mxu0 }
0x1b41   :  { %2438 = vst [vmem:[%s3576_s11] sm:$0xff] %v2432_v23  ;;  %v2435_v11 = vadd.f32 %v2515_v6, %v2434_v8  ;;  %v2855_v12 = vpop.f32.mrb[75].mxu0 }
0x1b43   :  { %2439 = vst [vmem:[%s3576_s11 + $0x8] sm:$0xff] %v2435_v11 }

</bundles_post_ra>
